<compile_context>
chip_gen: v5e
topology: v5e:2x2
jax: 0.10.0
libtpu: 0.0.40
codegen_flags: <defaults>
</compile_context>

<pallas_src>
import functools
import math

import jax
import jax.numpy as jnp
from jax.experimental import pallas as pl
from jax.experimental.pallas import tpu as pltpu


# -------------------------- small model config --------------------------
N_MELS = 8        # mel bins (input channels)
T_IN = 16         # mel frames
D_MODEL = 32      # whisper d_model (synthetic small)
N_HEADS = 4
HEAD_DIM = D_MODEL // N_HEADS
N_LAYERS = 2
FFN_DIM = 4 * D_MODEL
LN_EPS = 1e-5
BATCH = 2
CONV_K = 3
T_ENC = T_IN // 2          # encoder sequence length after stride-2 conv

_GELU_C = math.sqrt(2.0 / math.pi)


def _gelu(x):
    # tanh-approximate GELU (transcendental goes to the EUP slot).
    # TODO(synk): switch to the exact erf form if bit-parity with PyTorch is required.
    return 0.5 * x * (1.0 + jnp.tanh(_GELU_C * (x + 0.044715 * (x * x * x))))


def _norm(x):
    # LayerNorm normalization only; gamma/beta are folded into the consuming matmul.
    mu = jnp.mean(x, axis=-1, keepdims=True)
    var = jnp.mean((x - mu) ** 2, axis=-1, keepdims=True)
    return (x - mu) * jax.lax.rsqrt(var + LN_EPS)


# ------------------------- the single fused kernel ------------------------
def _fused_forward_kernel(
    x_ref,                                  # (1, n_mels, T_in) raw input block
    s1_ref, w1_ref, b1_ref,                 # conv1: stacked time-selection + taps
    sp2_ref, w2_ref, b2_ref,                # conv2: stacked stride-2 selection + taps
    pos_ref,                                # (T_enc, D) positional embedding
    wqkv_ref, bqkv_ref, wo_ref, bo_ref,     # per-layer attention weights (LN/scale folded)
    wf1_ref, bf1_ref, wf2_ref, bf2_ref,     # per-layer MLP weights (LN folded)
    fcw_ref, fcb_ref,                       # classifier head (final LN folded)
    out_ref,                                # (1, 1, 1)
    *, n_layers, n_heads,
):
    f32 = jnp.float32
    t_enc, d_model = pos_ref.shape
    head_dim = d_model // n_heads

    x_in = x_ref[0]                         # (n_mels, T_in)
    t_in = x_in.shape[1]

    # ---- conv1 (k=3, s=1, p=1) + GELU : im2col as constant selection matmul ----
    # g1[k*T_in + t, c] = x[c, t + k - 1]  (zero outside range)
    g1 = jax.lax.dot_general(s1_ref[...], x_in, (((1,), (1,)), ((), ())),
                             preferred_element_type=f32)          # (3*T_in, n_mels)
    h1 = jnp.zeros((t_in, d_model), f32)
    for k in range(CONV_K):
        h1 = h1 + jnp.dot(g1[k * t_in:(k + 1) * t_in], w1_ref[k],
                          preferred_element_type=f32)
    h1 = _gelu(h1 + b1_ref[...])                                  # (T_in, D)

    # ---- conv2 (k=3, s=2, p=1) + GELU, then + pos ----
    # single stacked gather matmul, then 3 sublane-aligned tap matmuls.
    g2 = jnp.dot(sp2_ref[...], h1, preferred_element_type=f32)    # (3*T_enc, D)
    acc2 = jnp.zeros((t_enc, d_model), f32)
    for k in range(CONV_K):
        acc2 = acc2 + jnp.dot(g2[k * t_enc:(k + 1) * t_enc], w2_ref[k],
                              preferred_element_type=f32)
    x = _gelu(acc2 + b2_ref[...]) + pos_ref[...]                  # (T_enc, D)

    # ---- transformer encoder layers ----
    for l in range(n_layers):
        wqkv_l = wqkv_ref[l]
        bqkv_l = bqkv_ref[l]
        wo_l = wo_ref[l]
        bo_l = bo_ref[l]

        # self-attention: ln1 gamma/beta and the q scale are folded into wqkv/bqkv.
        qkv = jnp.dot(_norm(x), wqkv_l, preferred_element_type=f32) + bqkv_l
        attn = jnp.zeros((t_enc, d_model), f32)
        for h in range(n_heads):
            lo = h * head_dim
            q_h = qkv[:, lo:lo + head_dim]
            k_h = qkv[:, d_model + lo:d_model + lo + head_dim]
            v_h = qkv[:, 2 * d_model + lo:2 * d_model + lo + head_dim]
            s = jax.lax.dot_general(q_h, k_h, (((1,), (1,)), ((), ())),
                                    preferred_element_type=f32)   # (T_enc, T_enc)
            e = jnp.exp(s - jnp.max(s, axis=-1, keepdims=True))
            p = e * pl.reciprocal(jnp.sum(e, axis=-1, keepdims=True), approx=True)
            o_h = jnp.dot(p, v_h, preferred_element_type=f32)     # (T_enc, head_dim)
            # fold the out-projection per head: accumulate in registers, no scratch.
            attn = attn + jnp.dot(o_h, wo_l[lo:lo + head_dim, :],
                                  preferred_element_type=f32)
        x = x + attn + bo_l

        # MLP (ln2 gamma/beta folded into wf1/bf1), residual fused.
        hmid = _gelu(jnp.dot(_norm(x), wf1_ref[l], preferred_element_type=f32)
                     + bf1_ref[l])
        x = x + jnp.dot(hmid, wf2_ref[l], preferred_element_type=f32) + bf2_ref[l]

    # ---- final LN (gamma/beta folded into head) + mean-pool + fc + sigmoid ----
    pooled = jnp.mean(_norm(x), axis=0, keepdims=True)            # (1, D)
    logits = jnp.dot(pooled, fcw_ref[...], preferred_element_type=f32) + fcb_ref[...]
    out_ref[...] = jax.nn.sigmoid(logits).reshape(1, 1, 1)


# ------------------------- host-side preparation -------------------------
def _make_conv_select(t_in, t_out_n, stride):
    """Stacked selection matrices S (CONV_K*t_out, t_in):
    S[k*t_out + t, t'] = 1 iff t' == stride*t + k - 1 (pad=1), in range."""
    t_out = jnp.arange(t_out_n)
    t_src = jnp.arange(t_in)
    mats = []
    for k in range(CONV_K):
        src = stride * t_out + k - 1
        m = ((t_src[None, :] == src[:, None])
             & (src[:, None] >= 0) & (src[:, None] < t_in))
        mats.append(m.astype(jnp.float32))
    return jnp.concatenate(mats, axis=0)


def prepare_kernel_inputs(params):
    """One-time weight preprocessing: conv tap stacking + selection constants,
    QKV fusion with q-scale & LayerNorm gamma/beta folding, per-layer stacking,
    final-LN folding into the classifier head."""
    scale = HEAD_DIM ** -0.5

    # conv stem
    s1 = _make_conv_select(T_IN, T_IN, stride=1)                    # (3*T_in, T_in)
    w1_taps = jnp.stack([params["conv1_w"][:, :, k].T for k in range(CONV_K)])  # (3,C,D)
    b1 = params["conv1_b"].reshape(1, -1)
    sp2 = _make_conv_select(T_IN, T_ENC, stride=2)                  # (3*T_enc, T_in)
    w2_taps = jnp.stack([params["conv2_w"][:, :, k].T for k in range(CONV_K)])  # (3,D,D)
    b2 = params["conv2_b"].reshape(1, -1)
    pos = params["pos"][:T_ENC]                                     # (T_enc, D)

    zero_kb = jnp.zeros((D_MODEL,), jnp.float32)   # Whisper k_proj has no bias
    wqkv_l, bqkv_l, wo_l, bo_l, wf1_l, bf1_l, wf2_l, bf2_l = ([] for _ in range(8))
    for p in params["layers"]:
        # q scale folded into Wq / bq; ln1 gamma/beta folded into the fused QKV matmul.
        wqkv_s = jnp.concatenate([p["wq"] * scale, p["wk"], p["wv"]], axis=1)  # (D,3D)
        bqkv_s = jnp.concatenate([p["bq"] * scale, zero_kb, p["bv"]])          # (3D,)
        wqkv_l.append(p["ln1_g"][:, None] * wqkv_s)
        bqkv_l.append((p["ln1_b"] @ wqkv_s + bqkv_s).reshape(1, -1))
        wo_l.append(p["wo"])
        bo_l.append(p["bo"].reshape(1, -1))
        # ln2 gamma/beta folded into fc1.
        wf1_l.append(p["ln2_g"][:, None] * p["w1"])
        bf1_l.append((p["ln2_b"] @ p["w1"] + p["b1"]).reshape(1, -1))
        wf2_l.append(p["w2"])
        bf2_l.append(p["b2"].reshape(1, -1))

    wqkv, bqkv = jnp.stack(wqkv_l), jnp.stack(bqkv_l)
    wo, bo = jnp.stack(wo_l), jnp.stack(bo_l)
    wf1, bf1 = jnp.stack(wf1_l), jnp.stack(bf1_l)
    wf2, bf2 = jnp.stack(wf2_l), jnp.stack(bf2_l)

    # final LN folded into the classifier head (valid: mean-pool weights sum to 1).
    fcw = params["lnf_g"][:, None] * params["fc_w"]                 # (D, 1)
    fcb = (params["lnf_b"] @ params["fc_w"] + params["fc_b"]).reshape(1, 1)

    return (s1, w1_taps, b1, sp2, w2_taps, b2, pos,
            wqkv, bqkv, wo, bo, wf1, bf1, wf2, bf2, fcw, fcb)


# ------------------------------ forward ----------------------------------
def _resident_spec(arr):
    """Full-array VMEM-resident block with a constant index_map (fetched once)."""
    nd = arr.ndim
    return pl.BlockSpec(arr.shape, lambda b, _nd=nd: (0,) * _nd,
                        memory_space=pltpu.MemorySpace.VMEM)


def whisper_classifier_forward(prep, input_features):
    # input_features: (B, n_mels, T)  -- NCW, like PyTorch.
    B = input_features.shape[0]

    kernel = functools.partial(_fused_forward_kernel,
                               n_layers=N_LAYERS, n_heads=N_HEADS)

    in_specs = [pl.BlockSpec((1, N_MELS, T_IN), lambda b: (b, 0, 0),
                             memory_space=pltpu.MemorySpace.VMEM)]
    in_specs += [_resident_spec(a) for a in prep]

    out = pl.pallas_call(
        kernel,
        grid=(B,),
        in_specs=in_specs,
        out_specs=pl.BlockSpec((1, 1, 1), lambda b: (b, 0, 0),
                               memory_space=pltpu.MemorySpace.VMEM),
        out_shape=jax.ShapeDtypeStruct((B, 1, 1), jnp.float32),
        compiler_params=pltpu.CompilerParams(
            dimension_semantics=("parallel",)),   # one sequence per TC on v7x
    )(input_features, *prep)
    return out[:, 0, 0]                                              # .squeeze(1)


# --------------------------- parameter init -------------------------------
def init_params(key):
    def dense(k, shape):
        return jax.random.normal(k, shape, jnp.float32) * 0.02

    n_rand = 4 + 6 * N_LAYERS
    keys = list(jax.random.split(key, n_rand))
    ki = iter(keys)

    params = {
        "conv1_w": dense(next(ki), (D_MODEL, N_MELS, 3)),
        "conv1_b": jnp.zeros((D_MODEL,), jnp.float32),
        "conv2_w": dense(next(ki), (D_MODEL, D_MODEL, 3)),
        "conv2_b": jnp.zeros((D_MODEL,), jnp.float32),
        "pos": dense(next(ki), (T_ENC, D_MODEL)),
        "lnf_g": jnp.ones((D_MODEL,), jnp.float32),
        "lnf_b": jnp.zeros((D_MODEL,), jnp.float32),
        "fc_w": dense(next(ki), (D_MODEL, 1)),
        "fc_b": jnp.zeros((1,), jnp.float32),
        "layers": [],
    }
    for _ in range(N_LAYERS):
        params["layers"].append({
            "ln1_g": jnp.ones((D_MODEL,), jnp.float32),
            "ln1_b": jnp.zeros((D_MODEL,), jnp.float32),
            "wq": dense(next(ki), (D_MODEL, D_MODEL)),
            "bq": jnp.zeros((D_MODEL,), jnp.float32),
            "wk": dense(next(ki), (D_MODEL, D_MODEL)),
            "wv": dense(next(ki), (D_MODEL, D_MODEL)),
            "bv": jnp.zeros((D_MODEL,), jnp.float32),
            "wo": dense(next(ki), (D_MODEL, D_MODEL)),
            "bo": jnp.zeros((D_MODEL,), jnp.float32),
            "ln2_g": jnp.ones((D_MODEL,), jnp.float32),
            "ln2_b": jnp.zeros((D_MODEL,), jnp.float32),
            "w1": dense(next(ki), (D_MODEL, FFN_DIM)),
            "b1": jnp.zeros((FFN_DIM,), jnp.float32),
            "w2": dense(next(ki), (FFN_DIM, D_MODEL)),
            "b2": jnp.zeros((D_MODEL,), jnp.float32),
        })
    return params


# ------------------------------- main -------------------------------------
if __name__ == "__main__":
    root = jax.random.PRNGKey(0)
    k_in, k_par = jax.random.split(root)
    params = init_params(k_par)
    # TODO(synk): pretrained openai/whisper-small weights are not loadable here; the
    # encoder uses deterministic synthetic parameters of the same structural form.
    input_features = jax.random.normal(k_in, (BATCH, N_MELS, T_IN), jnp.float32)

    prep = prepare_kernel_inputs(params)     # one-time weight preprocessing
    fwd = jax.jit(whisper_classifier_forward)
    probs = fwd(prep, input_features)
    jax.block_until_ready(probs)

    assert probs.shape == (BATCH,)
    assert bool(jnp.all(jnp.isfinite(probs)))
    assert bool(jnp.all((probs >= 0.0) & (probs <= 1.0)))
    print("KERNEL_OK")
</pallas_src>

<mosaic_0001>
module attributes {stable_mosaic.version = 11 : i64} {
  func.func @_fused_forward_kernel(%arg0: i32, %arg1: memref<1x8x16xf32, #tpu.memory_space<vmem>>, %arg2: memref<48x16xf32, #tpu.memory_space<vmem>>, %arg3: memref<3x8x32xf32, #tpu.memory_space<vmem>>, %arg4: memref<1x32xf32, #tpu.memory_space<vmem>>, %arg5: memref<24x16xf32, #tpu.memory_space<vmem>>, %arg6: memref<3x32x32xf32, #tpu.memory_space<vmem>>, %arg7: memref<1x32xf32, #tpu.memory_space<vmem>>, %arg8: memref<8x32xf32, #tpu.memory_space<vmem>>, %arg9: memref<2x32x96xf32, #tpu.memory_space<vmem>>, %arg10: memref<2x1x96xf32, #tpu.memory_space<vmem>>, %arg11: memref<2x32x32xf32, #tpu.memory_space<vmem>>, %arg12: memref<2x1x32xf32, #tpu.memory_space<vmem>>, %arg13: memref<2x32x128xf32, #tpu.memory_space<vmem>>, %arg14: memref<2x1x128xf32, #tpu.memory_space<vmem>>, %arg15: memref<2x128x32xf32, #tpu.memory_space<vmem>>, %arg16: memref<2x1x32xf32, #tpu.memory_space<vmem>>, %arg17: memref<32x1xf32, #tpu.memory_space<vmem>>, %arg18: memref<1x1xf32, #tpu.memory_space<vmem>>, %arg19: memref<1x1x1xf32, #tpu.memory_space<vmem>>) attributes {dimension_semantics = [#tpu.dimension_semantics<parallel>], iteration_bounds = array<i64: 2>, scalar_prefetch = 0 : i64, scratch_operands = 0 : i64, tpu.core_type = #tpu.core_type<tc>, window_params = [{transform_indices = @transform_0, window_bounds = array<i64: 1, 8, 16>}, {pipeline_mode = #tpu.pipeline_mode<synchronous>, transform_indices = @transform_1, window_bounds = array<i64: 48, 16>}, {pipeline_mode = #tpu.pipeline_mode<synchronous>, transform_indices = @transform_2, window_bounds = array<i64: 3, 8, 32>}, {pipeline_mode = #tpu.pipeline_mode<synchronous>, transform_indices = @transform_3, window_bounds = array<i64: 1, 32>}, {pipeline_mode = #tpu.pipeline_mode<synchronous>, transform_indices = @transform_4, window_bounds = array<i64: 24, 16>}, {pipeline_mode = #tpu.pipeline_mode<synchronous>, transform_indices = @transform_5, window_bounds = array<i64: 3, 32, 32>}, {pipeline_mode = #tpu.pipeline_mode<synchronous>, transform_indices = @transform_6, window_bounds = array<i64: 1, 32>}, {pipeline_mode = #tpu.pipeline_mode<synchronous>, transform_indices = @transform_7, window_bounds = array<i64: 8, 32>}, {pipeline_mode = #tpu.pipeline_mode<synchronous>, transform_indices = @transform_8, window_bounds = array<i64: 2, 32, 96>}, {pipeline_mode = #tpu.pipeline_mode<synchronous>, transform_indices = @transform_9, window_bounds = array<i64: 2, 1, 96>}, {pipeline_mode = #tpu.pipeline_mode<synchronous>, transform_indices = @transform_10, window_bounds = array<i64: 2, 32, 32>}, {pipeline_mode = #tpu.pipeline_mode<synchronous>, transform_indices = @transform_11, window_bounds = array<i64: 2, 1, 32>}, {pipeline_mode = #tpu.pipeline_mode<synchronous>, transform_indices = @transform_12, window_bounds = array<i64: 2, 32, 128>}, {pipeline_mode = #tpu.pipeline_mode<synchronous>, transform_indices = @transform_13, window_bounds = array<i64: 2, 1, 128>}, {pipeline_mode = #tpu.pipeline_mode<synchronous>, transform_indices = @transform_14, window_bounds = array<i64: 2, 128, 32>}, {pipeline_mode = #tpu.pipeline_mode<synchronous>, transform_indices = @transform_15, window_bounds = array<i64: 2, 1, 32>}, {pipeline_mode = #tpu.pipeline_mode<synchronous>, transform_indices = @transform_16, window_bounds = array<i64: 32, 1>}, {pipeline_mode = #tpu.pipeline_mode<synchronous>, transform_indices = @transform_17, window_bounds = array<i64: 1, 1>}, {transform_indices = @transform_18, window_bounds = array<i64: 1, 1, 1>}]} {
    %c0 = arith.constant 0 : index
    %c0_0 = arith.constant 0 : index
    %c0_1 = arith.constant 0 : index
    %0 = vector.load %arg1[%c0, %c0_0, %c0_1] : memref<1x8x16xf32, #tpu.memory_space<vmem>>, vector<1x8x16xf32>
    %1 = vector.shape_cast %0 : vector<1x8x16xf32> to vector<8x16xf32>
    %c0_2 = arith.constant 0 : index
    %c0_3 = arith.constant 0 : index
    %2 = vector.load %arg2[%c0_2, %c0_3] : memref<48x16xf32, #tpu.memory_space<vmem>>, vector<48x16xf32>
    %cst = arith.constant dense<0.000000e+00> : vector<48x8xf32>
    %3 = tpu.matmul %2, %1, %cst {dimension_numbers = #tpu.dot_dimension_numbers<[1], [1], [0], [0], [0, 0, 1, 0], [], []>} : vector<48x16xf32>, vector<8x16xf32>, vector<48x8xf32> -> vector<48x8xf32>
    %cst_4 = arith.constant 0.000000e+00 : f32
    %4 = vector.broadcast %cst_4 : f32 to vector<16x32xf32>
    %5 = vector.extract_strided_slice %3 {offsets = [0, 0], sizes = [16, 8], strides = [1, 1]} : vector<48x8xf32> to vector<16x8xf32>
    %c0_5 = arith.constant 0 : index
    %c0_6 = arith.constant 0 : index
    %c0_7 = arith.constant 0 : index
    %6 = vector.load %arg3[%c0_5, %c0_6, %c0_7] : memref<3x8x32xf32, #tpu.memory_space<vmem>>, vector<1x8x32xf32>
    %7 = vector.shape_cast %6 : vector<1x8x32xf32> to vector<8x32xf32>
    %cst_8 = arith.constant dense<0.000000e+00> : vector<16x32xf32>
    %8 = tpu.matmul %5, %7, %cst_8 {dimension_numbers = #tpu.dot_dimension_numbers<[1], [0], [0], [1], [0, 0, 1, 1], [], []>} : vector<16x8xf32>, vector<8x32xf32>, vector<16x32xf32> -> vector<16x32xf32>
    %9 = arith.addf %4, %8 : vector<16x32xf32>
    %10 = vector.extract_strided_slice %3 {offsets = [16, 0], sizes = [16, 8], strides = [1, 1]} : vector<48x8xf32> to vector<16x8xf32>
    %c1 = arith.constant 1 : index
    %c0_9 = arith.constant 0 : index
    %c0_10 = arith.constant 0 : index
    %11 = vector.load %arg3[%c1, %c0_9, %c0_10] : memref<3x8x32xf32, #tpu.memory_space<vmem>>, vector<1x8x32xf32>
    %12 = vector.shape_cast %11 : vector<1x8x32xf32> to vector<8x32xf32>
    %cst_11 = arith.constant dense<0.000000e+00> : vector<16x32xf32>
    %13 = tpu.matmul %10, %12, %cst_11 {dimension_numbers = #tpu.dot_dimension_numbers<[1], [0], [0], [1], [0, 0, 1, 1], [], []>} : vector<16x8xf32>, vector<8x32xf32>, vector<16x32xf32> -> vector<16x32xf32>
    %14 = arith.addf %9, %13 : vector<16x32xf32>
    %15 = vector.extract_strided_slice %3 {offsets = [32, 0], sizes = [16, 8], strides = [1, 1]} : vector<48x8xf32> to vector<16x8xf32>
    %c2 = arith.constant 2 : index
    %c0_12 = arith.constant 0 : index
    %c0_13 = arith.constant 0 : index
    %16 = vector.load %arg3[%c2, %c0_12, %c0_13] : memref<3x8x32xf32, #tpu.memory_space<vmem>>, vector<1x8x32xf32>
    %17 = vector.shape_cast %16 : vector<1x8x32xf32> to vector<8x32xf32>
    %cst_14 = arith.constant dense<0.000000e+00> : vector<16x32xf32>
    %18 = tpu.matmul %15, %17, %cst_14 {dimension_numbers = #tpu.dot_dimension_numbers<[1], [0], [0], [1], [0, 0, 1, 1], [], []>} : vector<16x8xf32>, vector<8x32xf32>, vector<16x32xf32> -> vector<16x32xf32>
    %19 = arith.addf %14, %18 : vector<16x32xf32>
    %c0_15 = arith.constant 0 : index
    %c0_16 = arith.constant 0 : index
    %20 = vector.load %arg4[%c0_15, %c0_16] : memref<1x32xf32, #tpu.memory_space<vmem>>, vector<1x32xf32>
    %21 = vector.broadcast %20 : vector<1x32xf32> to vector<16x32xf32>
    %22 = arith.addf %19, %21 : vector<16x32xf32>
    %cst_17 = arith.constant 5.000000e-01 : f32
    %23 = vector.broadcast %cst_17 : f32 to vector<16x32xf32>
    %24 = arith.mulf %23, %22 : vector<16x32xf32>
    %25 = arith.mulf %22, %22 : vector<16x32xf32>
    %26 = arith.mulf %25, %22 : vector<16x32xf32>
    %cst_18 = arith.constant 4.471500e-02 : f32
    %27 = vector.broadcast %cst_18 : f32 to vector<16x32xf32>
    %28 = arith.mulf %27, %26 : vector<16x32xf32>
    %29 = arith.addf %22, %28 : vector<16x32xf32>
    %cst_19 = arith.constant 0.797884583 : f32
    %30 = vector.broadcast %cst_19 : f32 to vector<16x32xf32>
    %31 = arith.mulf %30, %29 : vector<16x32xf32>
    %32 = math.tanh %31 : vector<16x32xf32>
    %cst_20 = arith.constant 1.000000e+00 : f32
    %33 = vector.broadcast %cst_20 : f32 to vector<16x32xf32>
    %34 = arith.addf %33, %32 : vector<16x32xf32>
    %35 = arith.mulf %24, %34 : vector<16x32xf32>
    %c0_21 = arith.constant 0 : index
    %c0_22 = arith.constant 0 : index
    %36 = vector.load %arg5[%c0_21, %c0_22] : memref<24x16xf32, #tpu.memory_space<vmem>>, vector<24x16xf32>
    %cst_23 = arith.constant dense<0.000000e+00> : vector<24x32xf32>
    %37 = tpu.matmul %36, %35, %cst_23 {dimension_numbers = #tpu.dot_dimension_numbers<[1], [0], [0], [1], [0, 0, 1, 1], [], []>} : vector<24x16xf32>, vector<16x32xf32>, vector<24x32xf32> -> vector<24x32xf32>
    %cst_24 = arith.constant 0.000000e+00 : f32
    %38 = vector.broadcast %cst_24 : f32 to vector<8x32xf32>
    %39 = vector.extract_strided_slice %37 {offsets = [0, 0], sizes = [8, 32], strides = [1, 1]} : vector<24x32xf32> to vector<8x32xf32>
    %c0_25 = arith.constant 0 : index
    %c0_26 = arith.constant 0 : index
    %c0_27 = arith.constant 0 : index
    %40 = vector.load %arg6[%c0_25, %c0_26, %c0_27] : memref<3x32x32xf32, #tpu.memory_space<vmem>>, vector<1x32x32xf32>
    %41 = vector.shape_cast %40 : vector<1x32x32xf32> to vector<32x32xf32>
    %cst_28 = arith.constant dense<0.000000e+00> : vector<8x32xf32>
    %42 = tpu.matmul %39, %41, %cst_28 {dimension_numbers = #tpu.dot_dimension_numbers<[1], [0], [0], [1], [0, 0, 1, 1], [], []>} : vector<8x32xf32>, vector<32x32xf32>, vector<8x32xf32> -> vector<8x32xf32>
    %43 = arith.addf %38, %42 : vector<8x32xf32>
    %44 = vector.extract_strided_slice %37 {offsets = [8, 0], sizes = [8, 32], strides = [1, 1]} : vector<24x32xf32> to vector<8x32xf32>
    %c1_29 = arith.constant 1 : index
    %c0_30 = arith.constant 0 : index
    %c0_31 = arith.constant 0 : index
    %45 = vector.load %arg6[%c1_29, %c0_30, %c0_31] : memref<3x32x32xf32, #tpu.memory_space<vmem>>, vector<1x32x32xf32>
    %46 = vector.shape_cast %45 : vector<1x32x32xf32> to vector<32x32xf32>
    %cst_32 = arith.constant dense<0.000000e+00> : vector<8x32xf32>
    %47 = tpu.matmul %44, %46, %cst_32 {dimension_numbers = #tpu.dot_dimension_numbers<[1], [0], [0], [1], [0, 0, 1, 1], [], []>} : vector<8x32xf32>, vector<32x32xf32>, vector<8x32xf32> -> vector<8x32xf32>
    %48 = arith.addf %43, %47 : vector<8x32xf32>
    %49 = vector.extract_strided_slice %37 {offsets = [16, 0], sizes = [8, 32], strides = [1, 1]} : vector<24x32xf32> to vector<8x32xf32>
    %c2_33 = arith.constant 2 : index
    %c0_34 = arith.constant 0 : index
    %c0_35 = arith.constant 0 : index
    %50 = vector.load %arg6[%c2_33, %c0_34, %c0_35] : memref<3x32x32xf32, #tpu.memory_space<vmem>>, vector<1x32x32xf32>
    %51 = vector.shape_cast %50 : vector<1x32x32xf32> to vector<32x32xf32>
    %cst_36 = arith.constant dense<0.000000e+00> : vector<8x32xf32>
    %52 = tpu.matmul %49, %51, %cst_36 {dimension_numbers = #tpu.dot_dimension_numbers<[1], [0], [0], [1], [0, 0, 1, 1], [], []>} : vector<8x32xf32>, vector<32x32xf32>, vector<8x32xf32> -> vector<8x32xf32>
    %53 = arith.addf %48, %52 : vector<8x32xf32>
    %c0_37 = arith.constant 0 : index
    %c0_38 = arith.constant 0 : index
    %54 = vector.load %arg7[%c0_37, %c0_38] : memref<1x32xf32, #tpu.memory_space<vmem>>, vector<1x32xf32>
    %55 = vector.broadcast %54 : vector<1x32xf32> to vector<8x32xf32>
    %56 = arith.addf %53, %55 : vector<8x32xf32>
    %cst_39 = arith.constant 5.000000e-01 : f32
    %57 = vector.broadcast %cst_39 : f32 to vector<8x32xf32>
    %58 = arith.mulf %57, %56 : vector<8x32xf32>
    %59 = arith.mulf %56, %56 : vector<8x32xf32>
    %60 = arith.mulf %59, %56 : vector<8x32xf32>
    %cst_40 = arith.constant 4.471500e-02 : f32
    %61 = vector.broadcast %cst_40 : f32 to vector<8x32xf32>
    %62 = arith.mulf %61, %60 : vector<8x32xf32>
    %63 = arith.addf %56, %62 : vector<8x32xf32>
    %cst_41 = arith.constant 0.797884583 : f32
    %64 = vector.broadcast %cst_41 : f32 to vector<8x32xf32>
    %65 = arith.mulf %64, %63 : vector<8x32xf32>
    %66 = math.tanh %65 : vector<8x32xf32>
    %cst_42 = arith.constant 1.000000e+00 : f32
    %67 = vector.broadcast %cst_42 : f32 to vector<8x32xf32>
    %68 = arith.addf %67, %66 : vector<8x32xf32>
    %69 = arith.mulf %58, %68 : vector<8x32xf32>
    %c0_43 = arith.constant 0 : index
    %c0_44 = arith.constant 0 : index
    %70 = vector.load %arg8[%c0_43, %c0_44] : memref<8x32xf32, #tpu.memory_space<vmem>>, vector<8x32xf32>
    %71 = arith.addf %69, %70 : vector<8x32xf32>
    %c0_45 = arith.constant 0 : index
    %c0_46 = arith.constant 0 : index
    %c0_47 = arith.constant 0 : index
    %72 = vector.load %arg9[%c0_45, %c0_46, %c0_47] : memref<2x32x96xf32, #tpu.memory_space<vmem>>, vector<1x32x96xf32>
    %73 = vector.shape_cast %72 : vector<1x32x96xf32> to vector<32x96xf32>
    %c0_48 = arith.constant 0 : index
    %c0_49 = arith.constant 0 : index
    %c0_50 = arith.constant 0 : index
    %74 = vector.load %arg10[%c0_48, %c0_49, %c0_50] : memref<2x1x96xf32, #tpu.memory_space<vmem>>, vector<1x1x96xf32>
    %75 = vector.shape_cast %74 : vector<1x1x96xf32> to vector<1x96xf32>
    %c0_51 = arith.constant 0 : index
    %c0_52 = arith.constant 0 : index
    %c0_53 = arith.constant 0 : index
    %76 = vector.load %arg11[%c0_51, %c0_52, %c0_53] : memref<2x32x32xf32, #tpu.memory_space<vmem>>, vector<1x32x32xf32>
    %77 = vector.shape_cast %76 : vector<1x32x32xf32> to vector<32x32xf32>
    %c0_54 = arith.constant 0 : index
    %c0_55 = arith.constant 0 : index
    %c0_56 = arith.constant 0 : index
    %78 = vector.load %arg12[%c0_54, %c0_55, %c0_56] : memref<2x1x32xf32, #tpu.memory_space<vmem>>, vector<1x1x32xf32>
    %79 = vector.shape_cast %78 : vector<1x1x32xf32> to vector<1x32xf32>
    %cst_57 = arith.constant dense<0.000000e+00> : vector<8xf32>
    %80 = vector.multi_reduction <add>, %71, %cst_57 [1] : vector<8x32xf32> to vector<8xf32>
    %81 = vector.shape_cast %80 : vector<8xf32> to vector<8x1xf32>
    %cst_58 = arith.constant 3.200000e+01 : f32
    %82 = vector.broadcast %cst_58 : f32 to vector<8x1xf32>
    %83 = arith.divf %81, %82 : vector<8x1xf32>
    %84 = vector.broadcast %83 : vector<8x1xf32> to vector<8x32xf32>
    %85 = arith.subf %71, %84 : vector<8x32xf32>
    %86 = arith.mulf %85, %85 : vector<8x32xf32>
    %cst_59 = arith.constant dense<0.000000e+00> : vector<8xf32>
    %87 = vector.multi_reduction <add>, %86, %cst_59 [1] : vector<8x32xf32> to vector<8xf32>
    %88 = vector.shape_cast %87 : vector<8xf32> to vector<8x1xf32>
    %cst_60 = arith.constant 3.200000e+01 : f32
    %89 = vector.broadcast %cst_60 : f32 to vector<8x1xf32>
    %90 = arith.divf %88, %89 : vector<8x1xf32>
    %91 = vector.broadcast %83 : vector<8x1xf32> to vector<8x32xf32>
    %92 = arith.subf %71, %91 : vector<8x32xf32>
    %cst_61 = arith.constant 9.99999974E-6 : f32
    %93 = vector.broadcast %cst_61 : f32 to vector<8x1xf32>
    %94 = arith.addf %90, %93 : vector<8x1xf32>
    %95 = math.rsqrt %94 : vector<8x1xf32>
    %96 = vector.broadcast %95 : vector<8x1xf32> to vector<8x32xf32>
    %97 = arith.mulf %92, %96 : vector<8x32xf32>
    %cst_62 = arith.constant dense<0.000000e+00> : vector<8x96xf32>
    %98 = tpu.matmul %97, %73, %cst_62 {dimension_numbers = #tpu.dot_dimension_numbers<[1], [0], [0], [1], [0, 0, 1, 1], [], []>} : vector<8x32xf32>, vector<32x96xf32>, vector<8x96xf32> -> vector<8x96xf32>
    %99 = vector.broadcast %75 : vector<1x96xf32> to vector<8x96xf32>
    %100 = arith.addf %98, %99 : vector<8x96xf32>
    %cst_63 = arith.constant 0.000000e+00 : f32
    %101 = vector.broadcast %cst_63 : f32 to vector<8x32xf32>
    %102 = vector.extract_strided_slice %100 {offsets = [0, 0], sizes = [8, 8], strides = [1, 1]} : vector<8x96xf32> to vector<8x8xf32>
    %103 = vector.extract_strided_slice %100 {offsets = [0, 32], sizes = [8, 8], strides = [1, 1]} : vector<8x96xf32> to vector<8x8xf32>
    %104 = vector.extract_strided_slice %100 {offsets = [0, 64], sizes = [8, 8], strides = [1, 1]} : vector<8x96xf32> to vector<8x8xf32>
    %cst_64 = arith.constant dense<0.000000e+00> : vector<8x8xf32>
    %105 = tpu.matmul %102, %103, %cst_64 {dimension_numbers = #tpu.dot_dimension_numbers<[1], [1], [0], [0], [0, 0, 1, 0], [], []>} : vector<8x8xf32>, vector<8x8xf32>, vector<8x8xf32> -> vector<8x8xf32>
    %cst_65 = arith.constant dense<0xFF800000> : vector<8xf32>
    %106 = vector.multi_reduction <maximumf>, %105, %cst_65 [1] : vector<8x8xf32> to vector<8xf32>
    %107 = vector.shape_cast %106 : vector<8xf32> to vector<8x1xf32>
    %108 = vector.broadcast %107 : vector<8x1xf32> to vector<8x8xf32>
    %109 = arith.subf %105, %108 : vector<8x8xf32>
    %110 = math.exp %109 : vector<8x8xf32>
    %cst_66 = arith.constant dense<0.000000e+00> : vector<8xf32>
    %111 = vector.multi_reduction <add>, %110, %cst_66 [1] : vector<8x8xf32> to vector<8xf32>
    %112 = vector.shape_cast %111 : vector<8xf32> to vector<8x1xf32>
    %113 = tpu.reciprocal %112 {approx = true} : vector<8x1xf32> -> vector<8x1xf32>
    %114 = vector.broadcast %113 : vector<8x1xf32> to vector<8x8xf32>
    %115 = arith.mulf %110, %114 : vector<8x8xf32>
    %cst_67 = arith.constant dense<0.000000e+00> : vector<8x8xf32>
    %116 = tpu.matmul %115, %104, %cst_67 {dimension_numbers = #tpu.dot_dimension_numbers<[1], [0], [0], [1], [0, 0, 1, 1], [], []>} : vector<8x8xf32>, vector<8x8xf32>, vector<8x8xf32> -> vector<8x8xf32>
    %117 = vector.extract_strided_slice %77 {offsets = [0, 0], sizes = [8, 32], strides = [1, 1]} : vector<32x32xf32> to vector<8x32xf32>
    %cst_68 = arith.constant dense<0.000000e+00> : vector<8x32xf32>
    %118 = tpu.matmul %116, %117, %cst_68 {dimension_numbers = #tpu.dot_dimension_numbers<[1], [0], [0], [1], [0, 0, 1, 1], [], []>} : vector<8x8xf32>, vector<8x32xf32>, vector<8x32xf32> -> vector<8x32xf32>
    %119 = arith.addf %101, %118 : vector<8x32xf32>
    %120 = vector.extract_strided_slice %100 {offsets = [0, 8], sizes = [8, 8], strides = [1, 1]} : vector<8x96xf32> to vector<8x8xf32>
    %121 = vector.extract_strided_slice %100 {offsets = [0, 40], sizes = [8, 8], strides = [1, 1]} : vector<8x96xf32> to vector<8x8xf32>
    %122 = vector.extract_strided_slice %100 {offsets = [0, 72], sizes = [8, 8], strides = [1, 1]} : vector<8x96xf32> to vector<8x8xf32>
    %cst_69 = arith.constant dense<0.000000e+00> : vector<8x8xf32>
    %123 = tpu.matmul %120, %121, %cst_69 {dimension_numbers = #tpu.dot_dimension_numbers<[1], [1], [0], [0], [0, 0, 1, 0], [], []>} : vector<8x8xf32>, vector<8x8xf32>, vector<8x8xf32> -> vector<8x8xf32>
    %cst_70 = arith.constant dense<0xFF800000> : vector<8xf32>
    %124 = vector.multi_reduction <maximumf>, %123, %cst_70 [1] : vector<8x8xf32> to vector<8xf32>
    %125 = vector.shape_cast %124 : vector<8xf32> to vector<8x1xf32>
    %126 = vector.broadcast %125 : vector<8x1xf32> to vector<8x8xf32>
    %127 = arith.subf %123, %126 : vector<8x8xf32>
    %128 = math.exp %127 : vector<8x8xf32>
    %cst_71 = arith.constant dense<0.000000e+00> : vector<8xf32>
    %129 = vector.multi_reduction <add>, %128, %cst_71 [1] : vector<8x8xf32> to vector<8xf32>
    %130 = vector.shape_cast %129 : vector<8xf32> to vector<8x1xf32>
    %131 = tpu.reciprocal %130 {approx = true} : vector<8x1xf32> -> vector<8x1xf32>
    %132 = vector.broadcast %131 : vector<8x1xf32> to vector<8x8xf32>
    %133 = arith.mulf %128, %132 : vector<8x8xf32>
    %cst_72 = arith.constant dense<0.000000e+00> : vector<8x8xf32>
    %134 = tpu.matmul %133, %122, %cst_72 {dimension_numbers = #tpu.dot_dimension_numbers<[1], [0], [0], [1], [0, 0, 1, 1], [], []>} : vector<8x8xf32>, vector<8x8xf32>, vector<8x8xf32> -> vector<8x8xf32>
    %135 = vector.extract_strided_slice %77 {offsets = [8, 0], sizes = [8, 32], strides = [1, 1]} : vector<32x32xf32> to vector<8x32xf32>
    %cst_73 = arith.constant dense<0.000000e+00> : vector<8x32xf32>
    %136 = tpu.matmul %134, %135, %cst_73 {dimension_numbers = #tpu.dot_dimension_numbers<[1], [0], [0], [1], [0, 0, 1, 1], [], []>} : vector<8x8xf32>, vector<8x32xf32>, vector<8x32xf32> -> vector<8x32xf32>
    %137 = arith.addf %119, %136 : vector<8x32xf32>
    %138 = vector.extract_strided_slice %100 {offsets = [0, 16], sizes = [8, 8], strides = [1, 1]} : vector<8x96xf32> to vector<8x8xf32>
    %139 = vector.extract_strided_slice %100 {offsets = [0, 48], sizes = [8, 8], strides = [1, 1]} : vector<8x96xf32> to vector<8x8xf32>
    %140 = vector.extract_strided_slice %100 {offsets = [0, 80], sizes = [8, 8], strides = [1, 1]} : vector<8x96xf32> to vector<8x8xf32>
    %cst_74 = arith.constant dense<0.000000e+00> : vector<8x8xf32>
    %141 = tpu.matmul %138, %139, %cst_74 {dimension_numbers = #tpu.dot_dimension_numbers<[1], [1], [0], [0], [0, 0, 1, 0], [], []>} : vector<8x8xf32>, vector<8x8xf32>, vector<8x8xf32> -> vector<8x8xf32>
    %cst_75 = arith.constant dense<0xFF800000> : vector<8xf32>
    %142 = vector.multi_reduction <maximumf>, %141, %cst_75 [1] : vector<8x8xf32> to vector<8xf32>
    %143 = vector.shape_cast %142 : vector<8xf32> to vector<8x1xf32>
    %144 = vector.broadcast %143 : vector<8x1xf32> to vector<8x8xf32>
    %145 = arith.subf %141, %144 : vector<8x8xf32>
    %146 = math.exp %145 : vector<8x8xf32>
    %cst_76 = arith.constant dense<0.000000e+00> : vector<8xf32>
    %147 = vector.multi_reduction <add>, %146, %cst_76 [1] : vector<8x8xf32> to vector<8xf32>
    %148 = vector.shape_cast %147 : vector<8xf32> to vector<8x1xf32>
    %149 = tpu.reciprocal %148 {approx = true} : vector<8x1xf32> -> vector<8x1xf32>
    %150 = vector.broadcast %149 : vector<8x1xf32> to vector<8x8xf32>
    %151 = arith.mulf %146, %150 : vector<8x8xf32>
    %cst_77 = arith.constant dense<0.000000e+00> : vector<8x8xf32>
    %152 = tpu.matmul %151, %140, %cst_77 {dimension_numbers = #tpu.dot_dimension_numbers<[1], [0], [0], [1], [0, 0, 1, 1], [], []>} : vector<8x8xf32>, vector<8x8xf32>, vector<8x8xf32> -> vector<8x8xf32>
    %153 = vector.extract_strided_slice %77 {offsets = [16, 0], sizes = [8, 32], strides = [1, 1]} : vector<32x32xf32> to vector<8x32xf32>
    %cst_78 = arith.constant dense<0.000000e+00> : vector<8x32xf32>
    %154 = tpu.matmul %152, %153, %cst_78 {dimension_numbers = #tpu.dot_dimension_numbers<[1], [0], [0], [1], [0, 0, 1, 1], [], []>} : vector<8x8xf32>, vector<8x32xf32>, vector<8x32xf32> -> vector<8x32xf32>
    %155 = arith.addf %137, %154 : vector<8x32xf32>
    %156 = vector.extract_strided_slice %100 {offsets = [0, 24], sizes = [8, 8], strides = [1, 1]} : vector<8x96xf32> to vector<8x8xf32>
    %157 = vector.extract_strided_slice %100 {offsets = [0, 56], sizes = [8, 8], strides = [1, 1]} : vector<8x96xf32> to vector<8x8xf32>
    %158 = vector.extract_strided_slice %100 {offsets = [0, 88], sizes = [8, 8], strides = [1, 1]} : vector<8x96xf32> to vector<8x8xf32>
    %cst_79 = arith.constant dense<0.000000e+00> : vector<8x8xf32>
    %159 = tpu.matmul %156, %157, %cst_79 {dimension_numbers = #tpu.dot_dimension_numbers<[1], [1], [0], [0], [0, 0, 1, 0], [], []>} : vector<8x8xf32>, vector<8x8xf32>, vector<8x8xf32> -> vector<8x8xf32>
    %cst_80 = arith.constant dense<0xFF800000> : vector<8xf32>
    %160 = vector.multi_reduction <maximumf>, %159, %cst_80 [1] : vector<8x8xf32> to vector<8xf32>
    %161 = vector.shape_cast %160 : vector<8xf32> to vector<8x1xf32>
    %162 = vector.broadcast %161 : vector<8x1xf32> to vector<8x8xf32>
    %163 = arith.subf %159, %162 : vector<8x8xf32>
    %164 = math.exp %163 : vector<8x8xf32>
    %cst_81 = arith.constant dense<0.000000e+00> : vector<8xf32>
    %165 = vector.multi_reduction <add>, %164, %cst_81 [1] : vector<8x8xf32> to vector<8xf32>
    %166 = vector.shape_cast %165 : vector<8xf32> to vector<8x1xf32>
    %167 = tpu.reciprocal %166 {approx = true} : vector<8x1xf32> -> vector<8x1xf32>
    %168 = vector.broadcast %167 : vector<8x1xf32> to vector<8x8xf32>
    %169 = arith.mulf %164, %168 : vector<8x8xf32>
    %cst_82 = arith.constant dense<0.000000e+00> : vector<8x8xf32>
    %170 = tpu.matmul %169, %158, %cst_82 {dimension_numbers = #tpu.dot_dimension_numbers<[1], [0], [0], [1], [0, 0, 1, 1], [], []>} : vector<8x8xf32>, vector<8x8xf32>, vector<8x8xf32> -> vector<8x8xf32>
    %171 = vector.extract_strided_slice %77 {offsets = [24, 0], sizes = [8, 32], strides = [1, 1]} : vector<32x32xf32> to vector<8x32xf32>
    %cst_83 = arith.constant dense<0.000000e+00> : vector<8x32xf32>
    %172 = tpu.matmul %170, %171, %cst_83 {dimension_numbers = #tpu.dot_dimension_numbers<[1], [0], [0], [1], [0, 0, 1, 1], [], []>} : vector<8x8xf32>, vector<8x32xf32>, vector<8x32xf32> -> vector<8x32xf32>
    %173 = arith.addf %155, %172 : vector<8x32xf32>
    %174 = arith.addf %71, %173 : vector<8x32xf32>
    %175 = vector.broadcast %79 : vector<1x32xf32> to vector<8x32xf32>
    %176 = arith.addf %174, %175 : vector<8x32xf32>
    %cst_84 = arith.constant dense<0.000000e+00> : vector<8xf32>
    %177 = vector.multi_reduction <add>, %176, %cst_84 [1] : vector<8x32xf32> to vector<8xf32>
    %178 = vector.shape_cast %177 : vector<8xf32> to vector<8x1xf32>
    %cst_85 = arith.constant 3.200000e+01 : f32
    %179 = vector.broadcast %cst_85 : f32 to vector<8x1xf32>
    %180 = arith.divf %178, %179 : vector<8x1xf32>
    %181 = vector.broadcast %180 : vector<8x1xf32> to vector<8x32xf32>
    %182 = arith.subf %176, %181 : vector<8x32xf32>
    %183 = arith.mulf %182, %182 : vector<8x32xf32>
    %cst_86 = arith.constant dense<0.000000e+00> : vector<8xf32>
    %184 = vector.multi_reduction <add>, %183, %cst_86 [1] : vector<8x32xf32> to vector<8xf32>
    %185 = vector.shape_cast %184 : vector<8xf32> to vector<8x1xf32>
    %cst_87 = arith.constant 3.200000e+01 : f32
    %186 = vector.broadcast %cst_87 : f32 to vector<8x1xf32>
    %187 = arith.divf %185, %186 : vector<8x1xf32>
    %188 = vector.broadcast %180 : vector<8x1xf32> to vector<8x32xf32>
    %189 = arith.subf %176, %188 : vector<8x32xf32>
    %cst_88 = arith.constant 9.99999974E-6 : f32
    %190 = vector.broadcast %cst_88 : f32 to vector<8x1xf32>
    %191 = arith.addf %187, %190 : vector<8x1xf32>
    %192 = math.rsqrt %191 : vector<8x1xf32>
    %193 = vector.broadcast %192 : vector<8x1xf32> to vector<8x32xf32>
    %194 = arith.mulf %189, %193 : vector<8x32xf32>
    %c0_89 = arith.constant 0 : index
    %c0_90 = arith.constant 0 : index
    %c0_91 = arith.constant 0 : index
    %195 = vector.load %arg13[%c0_89, %c0_90, %c0_91] : memref<2x32x128xf32, #tpu.memory_space<vmem>>, vector<1x32x128xf32>
    %196 = vector.shape_cast %195 : vector<1x32x128xf32> to vector<32x128xf32>
    %cst_92 = arith.constant dense<0.000000e+00> : vector<8x128xf32>
    %197 = tpu.matmul %194, %196, %cst_92 {dimension_numbers = #tpu.dot_dimension_numbers<[1], [0], [0], [1], [0, 0, 1, 1], [], []>} : vector<8x32xf32>, vector<32x128xf32>, vector<8x128xf32> -> vector<8x128xf32>
    %c0_93 = arith.constant 0 : index
    %c0_94 = arith.constant 0 : index
    %c0_95 = arith.constant 0 : index
    %198 = vector.load %arg14[%c0_93, %c0_94, %c0_95] : memref<2x1x128xf32, #tpu.memory_space<vmem>>, vector<1x1x128xf32>
    %199 = vector.shape_cast %198 : vector<1x1x128xf32> to vector<1x128xf32>
    %200 = vector.broadcast %199 : vector<1x128xf32> to vector<8x128xf32>
    %201 = arith.addf %197, %200 : vector<8x128xf32>
    %cst_96 = arith.constant 5.000000e-01 : f32
    %202 = vector.broadcast %cst_96 : f32 to vector<8x128xf32>
    %203 = arith.mulf %202, %201 : vector<8x128xf32>
    %204 = arith.mulf %201, %201 : vector<8x128xf32>
    %205 = arith.mulf %204, %201 : vector<8x128xf32>
    %cst_97 = arith.constant 4.471500e-02 : f32
    %206 = vector.broadcast %cst_97 : f32 to vector<8x128xf32>
    %207 = arith.mulf %206, %205 : vector<8x128xf32>
    %208 = arith.addf %201, %207 : vector<8x128xf32>
    %cst_98 = arith.constant 0.797884583 : f32
    %209 = vector.broadcast %cst_98 : f32 to vector<8x128xf32>
    %210 = arith.mulf %209, %208 : vector<8x128xf32>
    %211 = math.tanh %210 : vector<8x128xf32>
    %cst_99 = arith.constant 1.000000e+00 : f32
    %212 = vector.broadcast %cst_99 : f32 to vector<8x128xf32>
    %213 = arith.addf %212, %211 : vector<8x128xf32>
    %214 = arith.mulf %203, %213 : vector<8x128xf32>
    %c0_100 = arith.constant 0 : index
    %c0_101 = arith.constant 0 : index
    %c0_102 = arith.constant 0 : index
    %215 = vector.load %arg15[%c0_100, %c0_101, %c0_102] : memref<2x128x32xf32, #tpu.memory_space<vmem>>, vector<1x128x32xf32>
    %216 = vector.shape_cast %215 : vector<1x128x32xf32> to vector<128x32xf32>
    %cst_103 = arith.constant dense<0.000000e+00> : vector<8x32xf32>
    %217 = tpu.matmul %214, %216, %cst_103 {dimension_numbers = #tpu.dot_dimension_numbers<[1], [0], [0], [1], [0, 0, 1, 1], [], []>} : vector<8x128xf32>, vector<128x32xf32>, vector<8x32xf32> -> vector<8x32xf32>
    %218 = arith.addf %176, %217 : vector<8x32xf32>
    %c0_104 = arith.constant 0 : index
    %c0_105 = arith.constant 0 : index
    %c0_106 = arith.constant 0 : index
    %219 = vector.load %arg16[%c0_104, %c0_105, %c0_106] : memref<2x1x32xf32, #tpu.memory_space<vmem>>, vector<1x1x32xf32>
    %220 = vector.shape_cast %219 : vector<1x1x32xf32> to vector<1x32xf32>
    %221 = vector.broadcast %220 : vector<1x32xf32> to vector<8x32xf32>
    %222 = arith.addf %218, %221 : vector<8x32xf32>
    %c1_107 = arith.constant 1 : index
    %c0_108 = arith.constant 0 : index
    %c0_109 = arith.constant 0 : index
    %223 = vector.load %arg9[%c1_107, %c0_108, %c0_109] : memref<2x32x96xf32, #tpu.memory_space<vmem>>, vector<1x32x96xf32>
    %224 = vector.shape_cast %223 : vector<1x32x96xf32> to vector<32x96xf32>
    %c1_110 = arith.constant 1 : index
    %c0_111 = arith.constant 0 : index
    %c0_112 = arith.constant 0 : index
    %225 = vector.load %arg10[%c1_110, %c0_111, %c0_112] : memref<2x1x96xf32, #tpu.memory_space<vmem>>, vector<1x1x96xf32>
    %226 = vector.shape_cast %225 : vector<1x1x96xf32> to vector<1x96xf32>
    %c1_113 = arith.constant 1 : index
    %c0_114 = arith.constant 0 : index
    %c0_115 = arith.constant 0 : index
    %227 = vector.load %arg11[%c1_113, %c0_114, %c0_115] : memref<2x32x32xf32, #tpu.memory_space<vmem>>, vector<1x32x32xf32>
    %228 = vector.shape_cast %227 : vector<1x32x32xf32> to vector<32x32xf32>
    %c1_116 = arith.constant 1 : index
    %c0_117 = arith.constant 0 : index
    %c0_118 = arith.constant 0 : index
    %229 = vector.load %arg12[%c1_116, %c0_117, %c0_118] : memref<2x1x32xf32, #tpu.memory_space<vmem>>, vector<1x1x32xf32>
    %230 = vector.shape_cast %229 : vector<1x1x32xf32> to vector<1x32xf32>
    %cst_119 = arith.constant dense<0.000000e+00> : vector<8xf32>
    %231 = vector.multi_reduction <add>, %222, %cst_119 [1] : vector<8x32xf32> to vector<8xf32>
    %232 = vector.shape_cast %231 : vector<8xf32> to vector<8x1xf32>
    %cst_120 = arith.constant 3.200000e+01 : f32
    %233 = vector.broadcast %cst_120 : f32 to vector<8x1xf32>
    %234 = arith.divf %232, %233 : vector<8x1xf32>
    %235 = vector.broadcast %234 : vector<8x1xf32> to vector<8x32xf32>
    %236 = arith.subf %222, %235 : vector<8x32xf32>
    %237 = arith.mulf %236, %236 : vector<8x32xf32>
    %cst_121 = arith.constant dense<0.000000e+00> : vector<8xf32>
    %238 = vector.multi_reduction <add>, %237, %cst_121 [1] : vector<8x32xf32> to vector<8xf32>
    %239 = vector.shape_cast %238 : vector<8xf32> to vector<8x1xf32>
    %cst_122 = arith.constant 3.200000e+01 : f32
    %240 = vector.broadcast %cst_122 : f32 to vector<8x1xf32>
    %241 = arith.divf %239, %240 : vector<8x1xf32>
    %242 = vector.broadcast %234 : vector<8x1xf32> to vector<8x32xf32>
    %243 = arith.subf %222, %242 : vector<8x32xf32>
    %cst_123 = arith.constant 9.99999974E-6 : f32
    %244 = vector.broadcast %cst_123 : f32 to vector<8x1xf32>
    %245 = arith.addf %241, %244 : vector<8x1xf32>
    %246 = math.rsqrt %245 : vector<8x1xf32>
    %247 = vector.broadcast %246 : vector<8x1xf32> to vector<8x32xf32>
    %248 = arith.mulf %243, %247 : vector<8x32xf32>
    %cst_124 = arith.constant dense<0.000000e+00> : vector<8x96xf32>
    %249 = tpu.matmul %248, %224, %cst_124 {dimension_numbers = #tpu.dot_dimension_numbers<[1], [0], [0], [1], [0, 0, 1, 1], [], []>} : vector<8x32xf32>, vector<32x96xf32>, vector<8x96xf32> -> vector<8x96xf32>
    %250 = vector.broadcast %226 : vector<1x96xf32> to vector<8x96xf32>
    %251 = arith.addf %249, %250 : vector<8x96xf32>
    %cst_125 = arith.constant 0.000000e+00 : f32
    %252 = vector.broadcast %cst_125 : f32 to vector<8x32xf32>
    %253 = vector.extract_strided_slice %251 {offsets = [0, 0], sizes = [8, 8], strides = [1, 1]} : vector<8x96xf32> to vector<8x8xf32>
    %254 = vector.extract_strided_slice %251 {offsets = [0, 32], sizes = [8, 8], strides = [1, 1]} : vector<8x96xf32> to vector<8x8xf32>
    %255 = vector.extract_strided_slice %251 {offsets = [0, 64], sizes = [8, 8], strides = [1, 1]} : vector<8x96xf32> to vector<8x8xf32>
    %cst_126 = arith.constant dense<0.000000e+00> : vector<8x8xf32>
    %256 = tpu.matmul %253, %254, %cst_126 {dimension_numbers = #tpu.dot_dimension_numbers<[1], [1], [0], [0], [0, 0, 1, 0], [], []>} : vector<8x8xf32>, vector<8x8xf32>, vector<8x8xf32> -> vector<8x8xf32>
    %cst_127 = arith.constant dense<0xFF800000> : vector<8xf32>
    %257 = vector.multi_reduction <maximumf>, %256, %cst_127 [1] : vector<8x8xf32> to vector<8xf32>
    %258 = vector.shape_cast %257 : vector<8xf32> to vector<8x1xf32>
    %259 = vector.broadcast %258 : vector<8x1xf32> to vector<8x8xf32>
    %260 = arith.subf %256, %259 : vector<8x8xf32>
    %261 = math.exp %260 : vector<8x8xf32>
    %cst_128 = arith.constant dense<0.000000e+00> : vector<8xf32>
    %262 = vector.multi_reduction <add>, %261, %cst_128 [1] : vector<8x8xf32> to vector<8xf32>
    %263 = vector.shape_cast %262 : vector<8xf32> to vector<8x1xf32>
    %264 = tpu.reciprocal %263 {approx = true} : vector<8x1xf32> -> vector<8x1xf32>
    %265 = vector.broadcast %264 : vector<8x1xf32> to vector<8x8xf32>
    %266 = arith.mulf %261, %265 : vector<8x8xf32>
    %cst_129 = arith.constant dense<0.000000e+00> : vector<8x8xf32>
    %267 = tpu.matmul %266, %255, %cst_129 {dimension_numbers = #tpu.dot_dimension_numbers<[1], [0], [0], [1], [0, 0, 1, 1], [], []>} : vector<8x8xf32>, vector<8x8xf32>, vector<8x8xf32> -> vector<8x8xf32>
    %268 = vector.extract_strided_slice %228 {offsets = [0, 0], sizes = [8, 32], strides = [1, 1]} : vector<32x32xf32> to vector<8x32xf32>
    %cst_130 = arith.constant dense<0.000000e+00> : vector<8x32xf32>
    %269 = tpu.matmul %267, %268, %cst_130 {dimension_numbers = #tpu.dot_dimension_numbers<[1], [0], [0], [1], [0, 0, 1, 1], [], []>} : vector<8x8xf32>, vector<8x32xf32>, vector<8x32xf32> -> vector<8x32xf32>
    %270 = arith.addf %252, %269 : vector<8x32xf32>
    %271 = vector.extract_strided_slice %251 {offsets = [0, 8], sizes = [8, 8], strides = [1, 1]} : vector<8x96xf32> to vector<8x8xf32>
    %272 = vector.extract_strided_slice %251 {offsets = [0, 40], sizes = [8, 8], strides = [1, 1]} : vector<8x96xf32> to vector<8x8xf32>
    %273 = vector.extract_strided_slice %251 {offsets = [0, 72], sizes = [8, 8], strides = [1, 1]} : vector<8x96xf32> to vector<8x8xf32>
    %cst_131 = arith.constant dense<0.000000e+00> : vector<8x8xf32>
    %274 = tpu.matmul %271, %272, %cst_131 {dimension_numbers = #tpu.dot_dimension_numbers<[1], [1], [0], [0], [0, 0, 1, 0], [], []>} : vector<8x8xf32>, vector<8x8xf32>, vector<8x8xf32> -> vector<8x8xf32>
    %cst_132 = arith.constant dense<0xFF800000> : vector<8xf32>
    %275 = vector.multi_reduction <maximumf>, %274, %cst_132 [1] : vector<8x8xf32> to vector<8xf32>
    %276 = vector.shape_cast %275 : vector<8xf32> to vector<8x1xf32>
    %277 = vector.broadcast %276 : vector<8x1xf32> to vector<8x8xf32>
    %278 = arith.subf %274, %277 : vector<8x8xf32>
    %279 = math.exp %278 : vector<8x8xf32>
    %cst_133 = arith.constant dense<0.000000e+00> : vector<8xf32>
    %280 = vector.multi_reduction <add>, %279, %cst_133 [1] : vector<8x8xf32> to vector<8xf32>
    %281 = vector.shape_cast %280 : vector<8xf32> to vector<8x1xf32>
    %282 = tpu.reciprocal %281 {approx = true} : vector<8x1xf32> -> vector<8x1xf32>
    %283 = vector.broadcast %282 : vector<8x1xf32> to vector<8x8xf32>
    %284 = arith.mulf %279, %283 : vector<8x8xf32>
    %cst_134 = arith.constant dense<0.000000e+00> : vector<8x8xf32>
    %285 = tpu.matmul %284, %273, %cst_134 {dimension_numbers = #tpu.dot_dimension_numbers<[1], [0], [0], [1], [0, 0, 1, 1], [], []>} : vector<8x8xf32>, vector<8x8xf32>, vector<8x8xf32> -> vector<8x8xf32>
    %286 = vector.extract_strided_slice %228 {offsets = [8, 0], sizes = [8, 32], strides = [1, 1]} : vector<32x32xf32> to vector<8x32xf32>
    %cst_135 = arith.constant dense<0.000000e+00> : vector<8x32xf32>
    %287 = tpu.matmul %285, %286, %cst_135 {dimension_numbers = #tpu.dot_dimension_numbers<[1], [0], [0], [1], [0, 0, 1, 1], [], []>} : vector<8x8xf32>, vector<8x32xf32>, vector<8x32xf32> -> vector<8x32xf32>
    %288 = arith.addf %270, %287 : vector<8x32xf32>
    %289 = vector.extract_strided_slice %251 {offsets = [0, 16], sizes = [8, 8], strides = [1, 1]} : vector<8x96xf32> to vector<8x8xf32>
    %290 = vector.extract_strided_slice %251 {offsets = [0, 48], sizes = [8, 8], strides = [1, 1]} : vector<8x96xf32> to vector<8x8xf32>
    %291 = vector.extract_strided_slice %251 {offsets = [0, 80], sizes = [8, 8], strides = [1, 1]} : vector<8x96xf32> to vector<8x8xf32>
    %cst_136 = arith.constant dense<0.000000e+00> : vector<8x8xf32>
    %292 = tpu.matmul %289, %290, %cst_136 {dimension_numbers = #tpu.dot_dimension_numbers<[1], [1], [0], [0], [0, 0, 1, 0], [], []>} : vector<8x8xf32>, vector<8x8xf32>, vector<8x8xf32> -> vector<8x8xf32>
    %cst_137 = arith.constant dense<0xFF800000> : vector<8xf32>
    %293 = vector.multi_reduction <maximumf>, %292, %cst_137 [1] : vector<8x8xf32> to vector<8xf32>
    %294 = vector.shape_cast %293 : vector<8xf32> to vector<8x1xf32>
    %295 = vector.broadcast %294 : vector<8x1xf32> to vector<8x8xf32>
    %296 = arith.subf %292, %295 : vector<8x8xf32>
    %297 = math.exp %296 : vector<8x8xf32>
    %cst_138 = arith.constant dense<0.000000e+00> : vector<8xf32>
    %298 = vector.multi_reduction <add>, %297, %cst_138 [1] : vector<8x8xf32> to vector<8xf32>
    %299 = vector.shape_cast %298 : vector<8xf32> to vector<8x1xf32>
    %300 = tpu.reciprocal %299 {approx = true} : vector<8x1xf32> -> vector<8x1xf32>
    %301 = vector.broadcast %300 : vector<8x1xf32> to vector<8x8xf32>
    %302 = arith.mulf %297, %301 : vector<8x8xf32>
    %cst_139 = arith.constant dense<0.000000e+00> : vector<8x8xf32>
    %303 = tpu.matmul %302, %291, %cst_139 {dimension_numbers = #tpu.dot_dimension_numbers<[1], [0], [0], [1], [0, 0, 1, 1], [], []>} : vector<8x8xf32>, vector<8x8xf32>, vector<8x8xf32> -> vector<8x8xf32>
    %304 = vector.extract_strided_slice %228 {offsets = [16, 0], sizes = [8, 32], strides = [1, 1]} : vector<32x32xf32> to vector<8x32xf32>
    %cst_140 = arith.constant dense<0.000000e+00> : vector<8x32xf32>
    %305 = tpu.matmul %303, %304, %cst_140 {dimension_numbers = #tpu.dot_dimension_numbers<[1], [0], [0], [1], [0, 0, 1, 1], [], []>} : vector<8x8xf32>, vector<8x32xf32>, vector<8x32xf32> -> vector<8x32xf32>
    %306 = arith.addf %288, %305 : vector<8x32xf32>
    %307 = vector.extract_strided_slice %251 {offsets = [0, 24], sizes = [8, 8], strides = [1, 1]} : vector<8x96xf32> to vector<8x8xf32>
    %308 = vector.extract_strided_slice %251 {offsets = [0, 56], sizes = [8, 8], strides = [1, 1]} : vector<8x96xf32> to vector<8x8xf32>
    %309 = vector.extract_strided_slice %251 {offsets = [0, 88], sizes = [8, 8], strides = [1, 1]} : vector<8x96xf32> to vector<8x8xf32>
    %cst_141 = arith.constant dense<0.000000e+00> : vector<8x8xf32>
    %310 = tpu.matmul %307, %308, %cst_141 {dimension_numbers = #tpu.dot_dimension_numbers<[1], [1], [0], [0], [0, 0, 1, 0], [], []>} : vector<8x8xf32>, vector<8x8xf32>, vector<8x8xf32> -> vector<8x8xf32>
    %cst_142 = arith.constant dense<0xFF800000> : vector<8xf32>
    %311 = vector.multi_reduction <maximumf>, %310, %cst_142 [1] : vector<8x8xf32> to vector<8xf32>
    %312 = vector.shape_cast %311 : vector<8xf32> to vector<8x1xf32>
    %313 = vector.broadcast %312 : vector<8x1xf32> to vector<8x8xf32>
    %314 = arith.subf %310, %313 : vector<8x8xf32>
    %315 = math.exp %314 : vector<8x8xf32>
    %cst_143 = arith.constant dense<0.000000e+00> : vector<8xf32>
    %316 = vector.multi_reduction <add>, %315, %cst_143 [1] : vector<8x8xf32> to vector<8xf32>
    %317 = vector.shape_cast %316 : vector<8xf32> to vector<8x1xf32>
    %318 = tpu.reciprocal %317 {approx = true} : vector<8x1xf32> -> vector<8x1xf32>
    %319 = vector.broadcast %318 : vector<8x1xf32> to vector<8x8xf32>
    %320 = arith.mulf %315, %319 : vector<8x8xf32>
    %cst_144 = arith.constant dense<0.000000e+00> : vector<8x8xf32>
    %321 = tpu.matmul %320, %309, %cst_144 {dimension_numbers = #tpu.dot_dimension_numbers<[1], [0], [0], [1], [0, 0, 1, 1], [], []>} : vector<8x8xf32>, vector<8x8xf32>, vector<8x8xf32> -> vector<8x8xf32>
    %322 = vector.extract_strided_slice %228 {offsets = [24, 0], sizes = [8, 32], strides = [1, 1]} : vector<32x32xf32> to vector<8x32xf32>
    %cst_145 = arith.constant dense<0.000000e+00> : vector<8x32xf32>
    %323 = tpu.matmul %321, %322, %cst_145 {dimension_numbers = #tpu.dot_dimension_numbers<[1], [0], [0], [1], [0, 0, 1, 1], [], []>} : vector<8x8xf32>, vector<8x32xf32>, vector<8x32xf32> -> vector<8x32xf32>
    %324 = arith.addf %306, %323 : vector<8x32xf32>
    %325 = arith.addf %222, %324 : vector<8x32xf32>
    %326 = vector.broadcast %230 : vector<1x32xf32> to vector<8x32xf32>
    %327 = arith.addf %325, %326 : vector<8x32xf32>
    %cst_146 = arith.constant dense<0.000000e+00> : vector<8xf32>
    %328 = vector.multi_reduction <add>, %327, %cst_146 [1] : vector<8x32xf32> to vector<8xf32>
    %329 = vector.shape_cast %328 : vector<8xf32> to vector<8x1xf32>
    %cst_147 = arith.constant 3.200000e+01 : f32
    %330 = vector.broadcast %cst_147 : f32 to vector<8x1xf32>
    %331 = arith.divf %329, %330 : vector<8x1xf32>
    %332 = vector.broadcast %331 : vector<8x1xf32> to vector<8x32xf32>
    %333 = arith.subf %327, %332 : vector<8x32xf32>
    %334 = arith.mulf %333, %333 : vector<8x32xf32>
    %cst_148 = arith.constant dense<0.000000e+00> : vector<8xf32>
    %335 = vector.multi_reduction <add>, %334, %cst_148 [1] : vector<8x32xf32> to vector<8xf32>
    %336 = vector.shape_cast %335 : vector<8xf32> to vector<8x1xf32>
    %cst_149 = arith.constant 3.200000e+01 : f32
    %337 = vector.broadcast %cst_149 : f32 to vector<8x1xf32>
    %338 = arith.divf %336, %337 : vector<8x1xf32>
    %339 = vector.broadcast %331 : vector<8x1xf32> to vector<8x32xf32>
    %340 = arith.subf %327, %339 : vector<8x32xf32>
    %cst_150 = arith.constant 9.99999974E-6 : f32
    %341 = vector.broadcast %cst_150 : f32 to vector<8x1xf32>
    %342 = arith.addf %338, %341 : vector<8x1xf32>
    %343 = math.rsqrt %342 : vector<8x1xf32>
    %344 = vector.broadcast %343 : vector<8x1xf32> to vector<8x32xf32>
    %345 = arith.mulf %340, %344 : vector<8x32xf32>
    %c1_151 = arith.constant 1 : index
    %c0_152 = arith.constant 0 : index
    %c0_153 = arith.constant 0 : index
    %346 = vector.load %arg13[%c1_151, %c0_152, %c0_153] : memref<2x32x128xf32, #tpu.memory_space<vmem>>, vector<1x32x128xf32>
    %347 = vector.shape_cast %346 : vector<1x32x128xf32> to vector<32x128xf32>
    %cst_154 = arith.constant dense<0.000000e+00> : vector<8x128xf32>
    %348 = tpu.matmul %345, %347, %cst_154 {dimension_numbers = #tpu.dot_dimension_numbers<[1], [0], [0], [1], [0, 0, 1, 1], [], []>} : vector<8x32xf32>, vector<32x128xf32>, vector<8x128xf32> -> vector<8x128xf32>
    %c1_155 = arith.constant 1 : index
    %c0_156 = arith.constant 0 : index
    %c0_157 = arith.constant 0 : index
    %349 = vector.load %arg14[%c1_155, %c0_156, %c0_157] : memref<2x1x128xf32, #tpu.memory_space<vmem>>, vector<1x1x128xf32>
    %350 = vector.shape_cast %349 : vector<1x1x128xf32> to vector<1x128xf32>
    %351 = vector.broadcast %350 : vector<1x128xf32> to vector<8x128xf32>
    %352 = arith.addf %348, %351 : vector<8x128xf32>
    %cst_158 = arith.constant 5.000000e-01 : f32
    %353 = vector.broadcast %cst_158 : f32 to vector<8x128xf32>
    %354 = arith.mulf %353, %352 : vector<8x128xf32>
    %355 = arith.mulf %352, %352 : vector<8x128xf32>
    %356 = arith.mulf %355, %352 : vector<8x128xf32>
    %cst_159 = arith.constant 4.471500e-02 : f32
    %357 = vector.broadcast %cst_159 : f32 to vector<8x128xf32>
    %358 = arith.mulf %357, %356 : vector<8x128xf32>
    %359 = arith.addf %352, %358 : vector<8x128xf32>
    %cst_160 = arith.constant 0.797884583 : f32
    %360 = vector.broadcast %cst_160 : f32 to vector<8x128xf32>
    %361 = arith.mulf %360, %359 : vector<8x128xf32>
    %362 = math.tanh %361 : vector<8x128xf32>
    %cst_161 = arith.constant 1.000000e+00 : f32
    %363 = vector.broadcast %cst_161 : f32 to vector<8x128xf32>
    %364 = arith.addf %363, %362 : vector<8x128xf32>
    %365 = arith.mulf %354, %364 : vector<8x128xf32>
    %c1_162 = arith.constant 1 : index
    %c0_163 = arith.constant 0 : index
    %c0_164 = arith.constant 0 : index
    %366 = vector.load %arg15[%c1_162, %c0_163, %c0_164] : memref<2x128x32xf32, #tpu.memory_space<vmem>>, vector<1x128x32xf32>
    %367 = vector.shape_cast %366 : vector<1x128x32xf32> to vector<128x32xf32>
    %cst_165 = arith.constant dense<0.000000e+00> : vector<8x32xf32>
    %368 = tpu.matmul %365, %367, %cst_165 {dimension_numbers = #tpu.dot_dimension_numbers<[1], [0], [0], [1], [0, 0, 1, 1], [], []>} : vector<8x128xf32>, vector<128x32xf32>, vector<8x32xf32> -> vector<8x32xf32>
    %369 = arith.addf %327, %368 : vector<8x32xf32>
    %c1_166 = arith.constant 1 : index
    %c0_167 = arith.constant 0 : index
    %c0_168 = arith.constant 0 : index
    %370 = vector.load %arg16[%c1_166, %c0_167, %c0_168] : memref<2x1x32xf32, #tpu.memory_space<vmem>>, vector<1x1x32xf32>
    %371 = vector.shape_cast %370 : vector<1x1x32xf32> to vector<1x32xf32>
    %372 = vector.broadcast %371 : vector<1x32xf32> to vector<8x32xf32>
    %373 = arith.addf %369, %372 : vector<8x32xf32>
    %cst_169 = arith.constant dense<0.000000e+00> : vector<8xf32>
    %374 = vector.multi_reduction <add>, %373, %cst_169 [1] : vector<8x32xf32> to vector<8xf32>
    %375 = vector.shape_cast %374 : vector<8xf32> to vector<8x1xf32>
    %cst_170 = arith.constant 3.200000e+01 : f32
    %376 = vector.broadcast %cst_170 : f32 to vector<8x1xf32>
    %377 = arith.divf %375, %376 : vector<8x1xf32>
    %378 = vector.broadcast %377 : vector<8x1xf32> to vector<8x32xf32>
    %379 = arith.subf %373, %378 : vector<8x32xf32>
    %380 = arith.mulf %379, %379 : vector<8x32xf32>
    %cst_171 = arith.constant dense<0.000000e+00> : vector<8xf32>
    %381 = vector.multi_reduction <add>, %380, %cst_171 [1] : vector<8x32xf32> to vector<8xf32>
    %382 = vector.shape_cast %381 : vector<8xf32> to vector<8x1xf32>
    %cst_172 = arith.constant 3.200000e+01 : f32
    %383 = vector.broadcast %cst_172 : f32 to vector<8x1xf32>
    %384 = arith.divf %382, %383 : vector<8x1xf32>
    %385 = vector.broadcast %377 : vector<8x1xf32> to vector<8x32xf32>
    %386 = arith.subf %373, %385 : vector<8x32xf32>
    %cst_173 = arith.constant 9.99999974E-6 : f32
    %387 = vector.broadcast %cst_173 : f32 to vector<8x1xf32>
    %388 = arith.addf %384, %387 : vector<8x1xf32>
    %389 = math.rsqrt %388 : vector<8x1xf32>
    %390 = vector.broadcast %389 : vector<8x1xf32> to vector<8x32xf32>
    %391 = arith.mulf %386, %390 : vector<8x32xf32>
    %cst_174 = arith.constant dense<0.000000e+00> : vector<32xf32>
    %392 = vector.multi_reduction <add>, %391, %cst_174 [0] : vector<8x32xf32> to vector<32xf32>
    %393 = vector.shape_cast %392 : vector<32xf32> to vector<1x32xf32>
    %cst_175 = arith.constant 8.000000e+00 : f32
    %394 = vector.broadcast %cst_175 : f32 to vector<1x32xf32>
    %395 = arith.divf %393, %394 : vector<1x32xf32>
    %c0_176 = arith.constant 0 : index
    %c0_177 = arith.constant 0 : index
    %396 = vector.load %arg17[%c0_176, %c0_177] : memref<32x1xf32, #tpu.memory_space<vmem>>, vector<32x1xf32>
    %cst_178 = arith.constant dense<0.000000e+00> : vector<1x1xf32>
    %397 = tpu.matmul %395, %396, %cst_178 {dimension_numbers = #tpu.dot_dimension_numbers<[1], [0], [0], [1], [0, 0, 1, 1], [], []>} : vector<1x32xf32>, vector<32x1xf32>, vector<1x1xf32> -> vector<1x1xf32>
    %c0_179 = arith.constant 0 : index
    %c0_180 = arith.constant 0 : index
    %398 = vector.load %arg18[%c0_179, %c0_180] : memref<1x1xf32, #tpu.memory_space<vmem>>, vector<1x1xf32>
    %399 = arith.addf %397, %398 : vector<1x1xf32>
    %400 = arith.negf %399 : vector<1x1xf32>
    %401 = math.exp %400 : vector<1x1xf32>
    %cst_181 = arith.constant 1.000000e+00 : f32
    %402 = vector.broadcast %cst_181 : f32 to vector<1x1xf32>
    %403 = arith.addf %402, %401 : vector<1x1xf32>
    %404 = arith.divf %402, %403 : vector<1x1xf32>
    %405 = vector.shape_cast %404 : vector<1x1xf32> to vector<1x1x1xf32>
    %c0_182 = arith.constant 0 : index
    %c0_183 = arith.constant 0 : index
    %c0_184 = arith.constant 0 : index
    %406 = vector.load %arg19[%c0_182, %c0_183, %c0_184] : memref<1x1x1xf32, #tpu.memory_space<vmem>>, vector<1x1x1xf32>
    tpu.vector_store %arg19[%c0_182, %c0_183, %c0_184], %405 {strides = array<i32>} : memref<1x1x1xf32, #tpu.memory_space<vmem>>, vector<1x1x1xf32>,
    return
  }
  func.func @transform_0(%arg0: i32) -> (i32, i32, i32) {
    %c0_i32 = arith.constant 0 : i32
    %c0_i32_0 = arith.constant 0 : i32
    %c0_i32_1 = arith.constant 0 : i32
    return %arg0, %c0_i32, %c0_i32_0 : i32, i32, i32
  }
  func.func @transform_1(%arg0: i32) -> (i32, i32) {
    %c0_i32 = arith.constant 0 : i32
    %c0_i32_0 = arith.constant 0 : i32
    %c0_i32_1 = arith.constant 0 : i32
    return %c0_i32, %c0_i32_0 : i32, i32
  }
  func.func @transform_2(%arg0: i32) -> (i32, i32, i32) {
    %c0_i32 = arith.constant 0 : i32
    %c0_i32_0 = arith.constant 0 : i32
    %c0_i32_1 = arith.constant 0 : i32
    %c0_i32_2 = arith.constant 0 : i32
    return %c0_i32, %c0_i32_0, %c0_i32_1 : i32, i32, i32
  }
  func.func @transform_3(%arg0: i32) -> (i32, i32) {
    %c0_i32 = arith.constant 0 : i32
    %c0_i32_0 = arith.constant 0 : i32
    %c0_i32_1 = arith.constant 0 : i32
    return %c0_i32, %c0_i32_0 : i32, i32
  }
  func.func @transform_4(%arg0: i32) -> (i32, i32) {
    %c0_i32 = arith.constant 0 : i32
    %c0_i32_0 = arith.constant 0 : i32
    %c0_i32_1 = arith.constant 0 : i32
    return %c0_i32, %c0_i32_0 : i32, i32
  }
  func.func @transform_5(%arg0: i32) -> (i32, i32, i32) {
    %c0_i32 = arith.constant 0 : i32
    %c0_i32_0 = arith.constant 0 : i32
    %c0_i32_1 = arith.constant 0 : i32
    %c0_i32_2 = arith.constant 0 : i32
    return %c0_i32, %c0_i32_0, %c0_i32_1 : i32, i32, i32
  }
  func.func @transform_6(%arg0: i32) -> (i32, i32) {
    %c0_i32 = arith.constant 0 : i32
    %c0_i32_0 = arith.constant 0 : i32
    %c0_i32_1 = arith.constant 0 : i32
    return %c0_i32, %c0_i32_0 : i32, i32
  }
  func.func @transform_7(%arg0: i32) -> (i32, i32) {
    %c0_i32 = arith.constant 0 : i32
    %c0_i32_0 = arith.constant 0 : i32
    %c0_i32_1 = arith.constant 0 : i32
    return %c0_i32, %c0_i32_0 : i32, i32
  }
  func.func @transform_8(%arg0: i32) -> (i32, i32, i32) {
    %c0_i32 = arith.constant 0 : i32
    %c0_i32_0 = arith.constant 0 : i32
    %c0_i32_1 = arith.constant 0 : i32
    %c0_i32_2 = arith.constant 0 : i32
    return %c0_i32, %c0_i32_0, %c0_i32_1 : i32, i32, i32
  }
  func.func @transform_9(%arg0: i32) -> (i32, i32, i32) {
    %c0_i32 = arith.constant 0 : i32
    %c0_i32_0 = arith.constant 0 : i32
    %c0_i32_1 = arith.constant 0 : i32
    %c0_i32_2 = arith.constant 0 : i32
    return %c0_i32, %c0_i32_0, %c0_i32_1 : i32, i32, i32
  }
  func.func @transform_10(%arg0: i32) -> (i32, i32, i32) {
    %c0_i32 = arith.constant 0 : i32
    %c0_i32_0 = arith.constant 0 : i32
    %c0_i32_1 = arith.constant 0 : i32
    %c0_i32_2 = arith.constant 0 : i32
    return %c0_i32, %c0_i32_0, %c0_i32_1 : i32, i32, i32
  }
  func.func @transform_11(%arg0: i32) -> (i32, i32, i32) {
    %c0_i32 = arith.constant 0 : i32
    %c0_i32_0 = arith.constant 0 : i32
    %c0_i32_1 = arith.constant 0 : i32
    %c0_i32_2 = arith.constant 0 : i32
    return %c0_i32, %c0_i32_0, %c0_i32_1 : i32, i32, i32
  }
  func.func @transform_12(%arg0: i32) -> (i32, i32, i32) {
    %c0_i32 = arith.constant 0 : i32
    %c0_i32_0 = arith.constant 0 : i32
    %c0_i32_1 = arith.constant 0 : i32
    %c0_i32_2 = arith.constant 0 : i32
    return %c0_i32, %c0_i32_0, %c0_i32_1 : i32, i32, i32
  }
  func.func @transform_13(%arg0: i32) -> (i32, i32, i32) {
    %c0_i32 = arith.constant 0 : i32
    %c0_i32_0 = arith.constant 0 : i32
    %c0_i32_1 = arith.constant 0 : i32
    %c0_i32_2 = arith.constant 0 : i32
    return %c0_i32, %c0_i32_0, %c0_i32_1 : i32, i32, i32
  }
  func.func @transform_14(%arg0: i32) -> (i32, i32, i32) {
    %c0_i32 = arith.constant 0 : i32
    %c0_i32_0 = arith.constant 0 : i32
    %c0_i32_1 = arith.constant 0 : i32
    %c0_i32_2 = arith.constant 0 : i32
    return %c0_i32, %c0_i32_0, %c0_i32_1 : i32, i32, i32
  }
  func.func @transform_15(%arg0: i32) -> (i32, i32, i32) {
    %c0_i32 = arith.constant 0 : i32
    %c0_i32_0 = arith.constant 0 : i32
    %c0_i32_1 = arith.constant 0 : i32
    %c0_i32_2 = arith.constant 0 : i32
    return %c0_i32, %c0_i32_0, %c0_i32_1 : i32, i32, i32
  }
  func.func @transform_16(%arg0: i32) -> (i32, i32) {
    %c0_i32 = arith.constant 0 : i32
    %c0_i32_0 = arith.constant 0 : i32
    %c0_i32_1 = arith.constant 0 : i32
    return %c0_i32, %c0_i32_0 : i32, i32
  }
  func.func @transform_17(%arg0: i32) -> (i32, i32) {
    %c0_i32 = arith.constant 0 : i32
    %c0_i32_0 = arith.constant 0 : i32
    %c0_i32_1 = arith.constant 0 : i32
    return %c0_i32, %c0_i32_0 : i32, i32
  }
  func.func @transform_18(%arg0: i32) -> (i32, i32, i32) {
    %c0_i32 = arith.constant 0 : i32
    %c0_i32_0 = arith.constant 0 : i32
    %c0_i32_1 = arith.constant 0 : i32
    return %arg0, %c0_i32, %c0_i32_0 : i32, i32, i32
  }
}

</mosaic_0001>

<bundles_post_ra>
// kernel: whisper_classifier_forward.1
= control target key start
LH: loop header
LB: loop body
LE: loop exit
PB: predicated region body
PF: predicated region fallthrough
CT: control target
= control target key end

     0   :  { %s2399_s29 = smov 0   ;;  %s2870_s0 = inlined_call_operand.vmem [shape: f32[2,8,16], index: 0, kind: input, shape index: {}]   ;;  %s2871_s1 = inlined_call_operand.vmem [shape: f32[48,16], index: 1, kind: input, shape index: {}]   ;;  %s2872_s2 = inlined_call_operand.vmem [shape: f32[3,8,32], index: 2, kind: input, shape index: {}]   ;;  %s2873_s3 = inlined_call_operand.vmem [shape: f32[1,32], index: 3, kind: input, shape index: {}]   ;;  %s2874_s4 = inlined_call_operand.vmem [shape: f32[24,16], index: 4, kind: input, shape index: {}]   ;;  %s2875_s5 = inlined_call_operand.vmem [shape: f32[3,32,32], index: 5, kind: input, shape index: {}]   ;;  %s2876_s6 = inlined_call_operand.vmem [shape: f32[1,32], index: 6, kind: input, shape index: {}]   ;;  %s2877_s7 = inlined_call_operand.vmem [shape: f32[8,32], index: 7, kind: input, shape index: {}]   ;;  %s2878_s8 = inlined_call_operand.vmem [shape: f32[2,32,96], index: 8, kind: input, shape index: {}]   ;;  %s2879_s9 = inlined_call_operand.vmem [shape: f32[2,1,96], index: 9, kind: input, shape index: {}]   ;;  %s2880_s10 = inlined_call_operand.vmem [shape: f32[2,32,32], index: 10, kind: input, shape index: {}]   ;;  %s2881_s11 = inlined_call_operand.vmem [shape: f32[2,1,32], index: 11, kind: input, shape index: {}]   ;;  %s2882_s12 = inlined_call_operand.vmem [shape: f32[2,32,128], index: 12, kind: input, shape index: {}]   ;;  %s2883_s13 = inlined_call_operand.vmem [shape: f32[2,1,128], index: 13, kind: input, shape index: {}]   ;;  %s2884_s14 = inlined_call_operand.vmem [shape: f32[2,128,32], index: 14, kind: input, shape index: {}]   ;;  %s2885_s15 = inlined_call_operand.vmem [shape: f32[2,1,32], index: 15, kind: input, shape index: {}]   ;;  %s2886_s16 = inlined_call_operand.vmem [shape: f32[32,1], index: 16, kind: input, shape index: {}]   ;;  %s2887_s17 = inlined_call_operand.<no memory space> [shape: f32[1,1], index: 17, kind: input, shape index: {}]   ;;  %s2888_s18 = inlined_call_operand.vmem [shape: f32[2,1,1], index: 18, kind: output, shape index: {}]  }
   0x1   :  { %2900 = sst [smem:[#allocation3_spill]] %s2870_s0  ;;  %v23_v0 = vstv %s2887_s17 }
   0x2   :  { %2901 = sst [smem:[#allocation4_spill]] %s2871_s1  ;;  %24 = vst [vmem:[#allocation2] sm:$0x1] %v23_v0 }
   0x3   :  { %2902 = sst [smem:[#allocation5_spill]] %s2872_s2 }
   0x4 LB: > { %s2081_s30 = sadd.s32 4294967295, %s2286_s29   ;;  %p2085_p0 = scmp.ge.s32.totalorder %s2286_s29, 1  ;;  %s2286_s29 = sphi %s2399_s29, %s30_s29  }
   0x5   : > { %p513_p1 = scmp.lt.s32.totalorder %s2286_s29, 3 }
   0x7   : > { %p514_p2 = pnand %p2085_p0, %p513_p1 }
   0x8   : > { %p564_p3 = scmp.lt.s32.totalorder (!%p514_p2), %s2081_s30, 1  ;;  %s2903_s1 = sld [smem:[#allocation3_spill]] (!%p514_p2) }
   0x9   : > { %517 = sbr.rel (%p514_p2) target bundleno = 5460 (0x1554), region = 92  ;;  %s2904_s2 = sld [smem:[#allocation4_spill]] (!%p514_p2) }
   0xa   : > { %s2905_s22 = sld [smem:[#allocation5_spill]] (!%p514_p2)  ;;  %s2898_s25 = smov (!%p514_p2), 120  }
   0xb   : > { %s2290_s26 = smov (!%p514_p2), 96   ;;  %s2291_s27 = smov (!%p514_p2), 88  }
   0xc   : > { %s2892_s28 = smov (!%p514_p2), 64   ;;  %s2895_s0 = smov (!%p514_p2), 56  }
   0xd   : > { %s2894_s19 = smov (!%p514_p2), 72   ;;  %s2896_s23 = smov (!%p514_p2), 104  }
   0xe   : > { %s2916_s30 = smov (!%p564_p3, %s2081_s30), 1  ;;  %vm578_vm0 = vcmask 130048   ;;  %vm638_vm1 = vcmask 64512   ;;  %v2210_v22 = vld [vmem:[%s2873_s3] ss:$0 sm:$0xff]  ;;  %v795_v40 = vld [vmem:[%s2875_s5 + $0x18] sm:$0xff] }
   0xf   : > { %s2086_s17 = sshll.u32 %s2916_s30, 3  ;;  %v572_v2 = vld [vmem:[%s2904_s2] sm:$0xff]  ;;  %v573_v3 = vld [vmem:[%s2904_s2 + $0x8] sm:$0xff]  ;;  %v574_v4 = vld [vmem:[%s2904_s2 + $0x10] sm:$0xff]  ;;  %vm801_vm2 = vcmask 261120   ;;  %s2891_s21 = smov 40  }
  0x10   : > { %s567_s20 = scalar_lea.vmem %s2903_s1, %s2086_s17  ;;  %v575_v5 = vld [vmem:[%s2904_s2 + $0x18] sm:$0xff]  ;;  %v576_v6 = vld [vmem:[%s2904_s2 + $0x20] sm:$0xff]  ;;  %v577_v7 = vld [vmem:[%s2904_s2 + $0x28] sm:$0xff]  ;;  %s2899_s17 = smov 80  }
  0x11   : > { %v571_v1 = vld [vmem:[%s567_s20] sm:$0xff]  ;;  %v2094_v8 = vld [vmem:[%s2905_s22 + $0x8] sm:$0xff]  ;;  %v2099_v11 = vld [vmem:[%s2905_s22 + $0x10] sm:$0xff]  ;;  %s2897_s1 = smov 112   ;;  %s2893_s24 = smov 48  }
  0x12   : > { %2087 = vmatpush.xpose.msk.msra.mxu0 %vm578_vm0, %v571_v1  ;;  %660 = vmatpush.msra.mxu1 %v2094_v8  ;;  %v635_v9 = vld [vmem:[%s2905_s22] sm:$0xff]  ;;  %v794_v41 = vld [vmem:[%s2875_s5 + $0x10] sm:$0xff]  ;;  %v755_v51 = vld [vmem:[%s2874_s4 + $0x8] sm:$0xff] }
  0x13   : > { %2188 = vmatpush.msra.mxu2 %v2094_v8  ;;  %v754_v50 = vld [vmem:[%s2874_s4] sm:$0xff]  ;;  %v756_v52 = vld [vmem:[%s2874_s4 + $0x10] sm:$0xff]  ;;  %v793_v53 = vld [vmem:[%s2875_s5 + $0x8] sm:$0xff] }
  0x14   : > { %720 = vmatpush.msrb.mxu1 %v2099_v11  ;;  %v792_v54 = vld [vmem:[%s2875_s5] sm:$0xff]  ;;  %v2108_v55 = vld [vmem:[%s2875_s5 + $0x38] sm:$0xff]  ;;  %v2107_v56 = vld [vmem:[%s2875_s5 + $0x30] sm:$0xff] }
  0x15   : > { %2088 = vmatmul.msk.f32.vlgmr.msra.gmra.mxu0 %vm578_vm0, %v572_v2  ;;  %689 = vmatpush.msrb.mxu2 %v635_v9  ;;  %v2106_v57 = vld [vmem:[%s2875_s5 + $0x28] sm:$0xff]  ;;  %v2105_v58 = vld [vmem:[%s2875_s5 + $0x20] sm:$0xff]  ;;  %v2114_v59 = vld [vmem:[%s2875_s5 + $0x58] sm:$0xff] }
  0x16   : > { %840 = vmatpush.msrb.mxu0 %v795_v40  ;;  %v2113_v60 = vld [vmem:[%s2875_s5 + $0x50] sm:$0xff]  ;;  %v2112_v61 = vld [vmem:[%s2875_s5 + $0x48] sm:$0xff]  ;;  %v2111_v62 = vld [vmem:[%s2875_s5 + $0x40] sm:$0xff] }
  0x18   : > { %841 = vmatpush.msrb.mxu0 %v794_v41 }
  0x1a   : > { %842 = vmatpush.msrb.mxu0 %v793_v53 }
  0x1c   : > { %843 = vmatpush.msrb.mxu0 %v792_v54 }
  0x1d   : > { %2089 = vmatmul.msk.f32.gmra.mxu0 %vm578_vm0, %v573_v3 }
  0x25   : > { %2090 = vmatmul.msk.f32.gmra.mxu0 %vm578_vm0, %v574_v4 }
  0x2d   : > { %2091 = vmatmul.msk.f32.gmra.mxu0 %vm578_vm0, %v575_v5  ;;  %v2211_v5 = vld [vmem:[%s2876_s6] ss:$0 sm:$0xff] }
  0x35   : > { %2092 = vmatmul.msk.f32.gmra.mxu0 %vm578_vm0, %v576_v6 }
  0x3d   : > { %2093 = vmatmul.msk.f32.gmra.mxu0 %vm578_vm0, %v577_v7 }
  0x92   : > { %v617_v10 = vpop.f32.mrf.mxu0 }
  0x9a   : > { %v620_v12 = vpop.f32.mrf.mxu0 }
  0xa2   : > { %v623_v13 = vpop.f32.mrf.mxu0 }
  0xa3   : > { %2095 = vmatmul.msk.f32.vlgmr.msra.gmra.mxu1 %vm638_vm1, %v623_v13 }
  0xaa   : > { %v626_v14 = vpop.f32.mrf.mxu0 }
  0xab   : > { %2096 = vmatmul.msk.f32.vlgmr.msra.gmra.mxu2 %vm638_vm1, %v626_v14 }
  0xac   : > { %817 = vmatpush.msra.mxu2 %v2108_v55 }
  0xae   : > { %818 = vmatpush.msra.mxu2 %v2107_v56 }
  0xb0   : > { %819 = vmatpush.msra.mxu2 %v2106_v57 }
  0xb2   : > { %v629_v15 = vpop.f32.mrf.mxu0  ;;  %820 = vmatpush.msra.mxu2 %v2105_v58 }
  0xb3   : > { %2097 = vmatmul.msk.f32.vlgmr.msrb.gmra.mxu2 %vm638_vm1, %v617_v10  ;;  %2100 = vmatmul.msk.f32.vlgmr.msrb.gmra.mxu1 %vm638_vm1, %v629_v15 }
  0xb4   : > { %868 = vmatpush.msrb.mxu2 %v2114_v59 }
  0xb6   : > { %869 = vmatpush.msrb.mxu2 %v2113_v60 }
  0xb8   : > { %870 = vmatpush.msrb.mxu2 %v2112_v61 }
  0xba   : > { %v632_v16 = vpop.f32.mrf.mxu0  ;;  %871 = vmatpush.msrb.mxu2 %v2111_v62 }
  0xbb   : > { %2098 = vmatmul.msk.f32.gmra.mxu2 %vm638_vm1, %v620_v12  ;;  %2101 = vmatmul.msk.f32.gmra.mxu1 %vm638_vm1, %v632_v16 }
 0x120   : > { %v662_v17 = vpop.f32.mrf.mxu1 }
 0x12e   : > { %v665_v18 = vpop.f32.mrf.mxu2 }
 0x130   : > { %v722_v19 = vpop.f32.mrf.mxu1 }
 0x136   : > { %v691_v20 = vpop.f32.mrf.mxu2 }
 0x137   : > { %v692_v21 = vadd.f32 %v691_v20, %v662_v17  ;;  %v891_v17 = vld [vmem:[%s2877_s7] sm:$0xff] }
 0x138   : > { %v725_v27 = vpop.f32.mrf.mxu1 }
 0x139   : > { %v728_v23 = vadd.f32 %v722_v19, %v692_v21  ;;  %v2288_v21 = vmov 32.0  }
 0x13b   : > { %v734_v24 = vadd.f32 %v2210_v22, %v728_v23 }
 0x13d   : > { %v738_v25 = vmul.f32 %v734_v24, %v734_v24  ;;  %v736_v48 = vmul.f32 0.5, %v734_v24 }
 0x13e   : > { %v694_v26 = vpop.f32.mrf.mxu2 }
 0x13f   : > { %v740_v28 = vmul.f32 %v738_v25, %v734_v24  ;;  %v695_v29 = vadd.f32 %v694_v26, %v665_v18 }
 0x141   : > { %v729_v30 = vadd.f32 %v725_v27, %v695_v29  ;;  %v742_v31 = vmul.f32 0.044715, %v740_v28 }
 0x143   : > { %v735_v32 = vadd.f32 %v2210_v22, %v729_v30  ;;  %v744_v34 = vadd.f32 %v742_v31, %v734_v24 }
 0x145   : > { %v739_v33 = vmul.f32 %v735_v32, %v735_v32  ;;  %v746_v37 = vmul.f32 0.7978846, %v744_v34  ;;  %v737_v44 = vmul.f32 0.5, %v735_v32  ;;  %v895_v34 = vld [vmem:[%s2878_s8 + $0x10] sm:$0xff] }
 0x147   : > { %v741_v35 = vmul.f32 %v739_v33, %v735_v32  ;;  %2220 = vtanh.f32 %v746_v37  ;;  %v896_v33 = vld [vmem:[%s2878_s8 + $0x18] sm:$0xff] }
 0x148   : > { %950 = vmatpush.msra.mxu3 %v896_v33 }
 0x149   : > { %v743_v36 = vmul.f32 0.044715, %v741_v35  ;;  %v894_v35 = vld [vmem:[%s2878_s8 + $0x8] sm:$0xff] }
 0x14a   : > { %951 = vmatpush.msra.mxu3 %v895_v34 }
 0x14b   : > { %v745_v38 = vadd.f32 %v743_v36, %v735_v32  ;;  %v893_v36 = vld [vmem:[%s2878_s8] sm:$0xff] }
 0x14c   : > { %952 = vmatpush.msra.mxu3 %v894_v35 }
 0x14d   : > { %v747_v39 = vmul.f32 0.7978846, %v745_v38  ;;  %v2221_v42 = vpop.eup %2220 }
 0x14e   : > { %v750_v46 = vadd.f32 1.0, %v2221_v42  ;;  %953 = vmatpush.msra.mxu3 %v893_v36 }
 0x14f   : > { %2222 = vtanh.f32 %v747_v39 }
 0x150   : > { %v752_v49 = vmul.f32 %v750_v46, %v736_v48  ;;  %v2212_v48 = vld [vmem:[%s2879_s9] ss:$0 sm:$0xff] }
 0x155   : > { %v2223_v43 = vpop.eup %2222 }
 0x156   : > { %v751_v45 = vadd.f32 1.0, %v2223_v43 }
 0x158   : > { %v753_v47 = vmul.f32 %v751_v45, %v737_v44 }
 0x15a   : > { %780 = vmatpush.msra.mxu1 %v753_v47 }
 0x15c   : > { %781 = vmatpush.msra.mxu1 %v752_v49 }
 0x15d   : > { %2102 = vmatmul.msk.f32.vlgmr.msra.gmra.mxu1 %vm578_vm0, %v754_v50 }
 0x165   : > { %2103 = vmatmul.msk.f32.gmra.mxu1 %vm578_vm0, %v755_v51 }
 0x16d   : > { %2104 = vmatmul.msk.f32.gmra.mxu1 %vm578_vm0, %v756_v52 }
 0x1da   : > { %v783_v63 = vpop.f32.mrf.mxu1 }
 0x1db   : > { %2110 = vmatmul.msk.f32.vlgmr.msrb.gmra.mxu0 %vm801_vm2, %v783_v63 }
 0x1e2   : > { %v786_v0 = vpop.f32.mrf.mxu1 }
 0x1e3   : > { %2109 = vmatmul.msk.f32.vlgmr.msra.gmra.mxu2 %vm801_vm2, %v786_v0  ;;  %v898_v0 = vld [vmem:[%s2880_s10] sm:$0xff] }
 0x1ea   : > { %v789_v1 = vpop.f32.mrf.mxu1 }
 0x1eb   : > { %2115 = vmatmul.msk.f32.vlgmr.msrb.gmra.mxu2 %vm801_vm2, %v789_v1 }
 0x258   : > { %v845_v3 = vpop.f32.mrf.mxu0 }
 0x266   : > { %v822_v2 = vpop.f32.mrf.mxu2 }
 0x267   : > { %v846_v4 = vadd.f32 %v845_v3, %v822_v2 }
 0x26e   : > { %v873_v6 = vpop.f32.mrf.mxu2 }
 0x26f   : > { %v876_v7 = vadd.f32 %v873_v6, %v846_v4 }
 0x271   : > { %v881_v8 = vadd.f32 %v2211_v5, %v876_v7 }
 0x273   : > { %v883_v9 = vmul.f32 %v881_v8, %v881_v8  ;;  %v882_v15 = vmul.f32 0.5, %v881_v8 }
 0x275   : > { %v884_v10 = vmul.f32 %v883_v9, %v881_v8 }
 0x277   : > { %v885_v11 = vmul.f32 0.044715, %v884_v10 }
 0x279   : > { %v886_v12 = vadd.f32 %v885_v11, %v881_v8 }
 0x27b   : > { %v887_v13 = vmul.f32 0.7978846, %v886_v12 }
 0x27d   : > { %2224 = vtanh.f32 %v887_v13 }
 0x27e   : > { %2226 = vrcp.f32 %v2288_v21 }
 0x283   : > { %v2225_v14 = vpop.eup %2224 }
 0x284   : > { %v889_v16 = vadd.f32 1.0, %v2225_v14  ;;  %v2227_v22 = vpop.eup %2226 }
 0x285   : > { %v907_v23 = vmul.f32 32.0, %v2227_v22  ;;  %vm911_vm3 = vweird.f32 %v2227_v22 }
 0x286   : > { %v890_v18 = vmul.f32 %v889_v16, %v882_v15 }
 0x287   : > { %v908_v24 = vsub.f32 1.0, %v907_v23 }
 0x288   : > { %v2513_v19 = vadd.f32 %v891_v17, %v890_v18  ;;  %v899_v18 = vld [vmem:[%s2880_s10 + $0x8] sm:$0xff] }
 0x289   : > { %v909_v25 = vmul.f32 %v2227_v22, %v908_v24 }
 0x28a   : > { %v903_v20 = vsel %vm801_vm2, %v2513_v19, 0.0 }
 0x28b   : > { %904 = vadd.xlane.f32.xlu0 %v903_v20  ;;  %v910_v26 = vadd.f32 %v2227_v22, %v909_v25 }
 0x28d   : > { %v2517_v27 = vsel %vm911_vm3, %v2227_v22, %v910_v26 }
 0x2fe   : > { %v905_v28 = vpop.xlane.xlu0 %904 }
 0x2ff   : > { %v913_v29 = vmul.f32 %v2517_v27, %v905_v28 }
 0x301   : > { %v914_v30 = vsub.f32 %v2513_v19, %v913_v29 }
 0x303   : > { %v915_v31 = vmul.f32 %v914_v30, %v914_v30 }
 0x305   : > { %v916_v32 = vsel %vm801_vm2, %v915_v31, 0.0 }
 0x306   : > { %917 = vadd.xlane.f32.xlu0 %v916_v32 }
 0x379   : > { %v918_v37 = vpop.xlane.xlu0 %917 }
 0x37a   : > { %v919_v38 = vmul.f32 %v918_v37, %v2517_v27 }
 0x37c   : > { %v920_v39 = vadd.f32 1e-05, %v919_v38 }
 0x37e   : > { %2228 = vrsqrt.f32 %v920_v39  ;;  %vm927_vm5 = vweird.f32 %v920_v39 }
 0x384   : > { %v2229_v40 = vpop.eup %2228 }
 0x385   : > { %v922_v41 = vmul.f32 %v2229_v40, %v920_v39  ;;  %vm928_vm4 = vweird.f32 %v2229_v40 }
 0x386   : > { %vm929_vm6 = vmor %vm927_vm5, %vm928_vm4 }
 0x387   : > { %v923_v42 = vmul.f32 %v2229_v40, %v922_v41 }
 0x389   : > { %v924_v43 = vmul.f32 0.5, %v923_v42 }
 0x38b   : > { %v925_v44 = vsub.f32 1.5, %v924_v43 }
 0x38d   : > { %v926_v45 = vmul.f32 %v2229_v40, %v925_v44 }
 0x38f   : > { %v930_v46 = vsel %vm929_vm6, %v2229_v40, %v926_v45  ;;  %v901_v45 = vld [vmem:[%s2880_s10 + $0x18] sm:$0xff] }
 0x390   : > { %v931_v47 = vmul.f32 %v930_v46, %v914_v30  ;;  %v900_v46 = vld [vmem:[%s2880_s10 + $0x10] sm:$0xff] }
 0x391   : > { %1216 = vmatpush.msra.mxu0 %v900_v46 }
 0x392   : > { %2116 = vmatmul.msk.f32.vlgmr.msra.gmra.mxu3 %vm801_vm2, %v931_v47 }
 0x415   : > { %v955_v49 = vpop.f32.mrf.mxu3 }
 0x416   : > { %v2539_v50 = vadd.f32 %v2212_v48, %v955_v49 }
 0x418   : > { %1022 = vrot.lane.b32.xlu2 %v2539_v50, %s2898_s25  ;;  %959 = vrot.lane.b32.xlu1 %v2539_v50, %s2290_s26  ;;  %s2908_s25 = smov 112  }
 0x420   : > { %1024 = vrot.lane.b32.xlu1 %v2539_v50, %s2291_s27 }
 0x428   : > { %996 = vrot.lane.b32.xlu1 %v2539_v50, %s2892_s28 }
 0x472   : > { %v1023_v53 = vpop.permute.xlu2 %1022 }
 0x48a   : > { %v960_v51 = vpop.permute.xlu1 %959 }
 0x48b   : > { %2117 = vmatpush.xpose.msk.msra.mxu2 %vm638_vm1, %v960_v51 }
 0x48e   : > { %2118 = vmatmul.msk.f32.vlgmr.msra.gmra.mxu2 %vm638_vm1, %v2539_v50 }
 0x492   : > { %v1025_v52 = vpop.permute.xlu1 %1024 }
 0x493   : > { %2120 = vmatpush.xpose.msk.msrb.mxu1 %vm638_vm1, %v1025_v52 }
 0x496   : > { %2121 = vmatmul.msk.f32.vlgmr.msrb.gmra.mxu1 %vm638_vm1, %v1023_v53 }
 0x497   : > { %1128 = vmatpush.msra.mxu1 %v898_v0  ;;  %v1341_v0 = vld [vmem:[%s2882_s12 + $0x18] sm:$0xff] }
 0x498   : > { %1361 = vmatpush.msrb.mxu0 %v1341_v0 }
 0x49a   : > { %v997_v54 = vpop.permute.xlu1 %996 }
 0x49b   : > { %1017 = vmatpush.msrb.mxu3 %v997_v54 }
 0x49d   : > { %1105 = vmatpush.msra.mxu3 %v899_v18  ;;  %v1389_v18 = vld [vmem:[%s2884_s14 + $0x58] sm:$0xff] }
 0x511   : > { %v982_v55 = vpop.f32.mrf.mxu2 }
 0x512   : > { %v985_v56 = vsel %vm638_vm1, %v982_v55, -inf }
 0x513   : > { %986 = vmax.xlane.f32.xlu2 %v985_v56  ;;  %v1047_v62 = vpop.f32.mrf.mxu1 }
 0x514   : > { %v1050_v63 = vsel %vm638_vm1, %v1047_v62, -inf }
 0x52b   : > { %1135 = vrot.lane.b32.xlu2 %v2539_v50, %s2899_s17  ;;  %s2909_s17 = smov 104  }
 0x586   : > { %v987_v57 = vpop.xlane.xlu2 %986 }
 0x587   : > { %v988_v58 = vsub.f32 %v982_v55, %v987_v57  ;;  %v2213_v55 = vld [vmem:[%s2881_s11] ss:$0 sm:$0xff] }
 0x589   : > { %v989_v59 = vmul.f32 1.442695, %v988_v58 }
 0x58b   : > { %2230 = vpow2.f32 %v989_v59 }
 0x58e   : > { %v1136_v10 = vpop.permute.xlu2 %1135 }
 0x591   : > { %v2231_v60 = vpop.eup %2230 }
 0x592   : > { %v991_v61 = vsel %vm638_vm1, %v2231_v60, 0.0 }
 0x593   : > { %992 = vadd.xlane.f32.xlu0 %v991_v61 }
 0x59b   : > { %1051 = vmax.xlane.f32.xlu0 %v1050_v63 }
 0x5af   : > { %1061 = vrot.lane.b32.xlu0 %v2539_v50, %s2895_s0  ;;  %s2906_s0 = smov 80  }
 0x5b7   : > { %1224 = vrot.lane.b32.xlu0 %v2539_v50, %s2894_s19  ;;  %s2907_s19 = smov 120  }
 0x5bf   : > { %1133 = vrot.lane.b32.xlu0 %v2539_v50, %s2897_s1  ;;  %s2912_s1 = smov 48  }
 0x606   : > { %v993_v1 = vpop.xlane.xlu0 %992 }
 0x607   : > { %2232 = vrcp.f32 %v993_v1  ;;  %v1339_v1 = vld [vmem:[%s2882_s12 + $0x8] sm:$0xff] }
 0x60d   : > { %v2233_v2 = vpop.eup %2232 }
 0x60e   : > { %v1052_v3 = vpop.xlane.xlu0 %1051  ;;  %v995_v4 = vmul.f32 %v2233_v2, %v2231_v60  ;;  %v1338_v2 = vld [vmem:[%s2882_s12] sm:$0xff] }
 0x60f   : > { %v1053_v5 = vsub.f32 %v1047_v62, %v1052_v3  ;;  %v1393_v3 = vld [vmem:[%s2884_s14 + $0x78] sm:$0xff] }
 0x610   : > { %2119 = vmatmul.msk.f32.vlgmr.msrb.gmra.mxu3 %vm638_vm1, %v995_v4  ;;  %v1392_v4 = vld [vmem:[%s2884_s14 + $0x70] sm:$0xff] }
 0x611   : > { %v1054_v6 = vmul.f32 1.442695, %v1053_v5  ;;  %v1391_v5 = vld [vmem:[%s2884_s14 + $0x68] sm:$0xff] }
 0x613   : > { %2234 = vpow2.f32 %v1054_v6  ;;  %v1390_v6 = vld [vmem:[%s2884_s14 + $0x60] sm:$0xff] }
 0x619   : > { %v2235_v7 = vpop.eup %2234 }
 0x61a   : > { %v1056_v8 = vsel %vm638_vm1, %v2235_v7, 0.0 }
 0x61b   : > { %1057 = vadd.xlane.f32.xlu1 %v1056_v8 }
 0x621   : > { %v1062_v9 = vpop.permute.xlu0 %1061 }
 0x622   : > { %1082 = vmatpush.msrb.mxu2 %v1062_v9 }
 0x624   : > { %2125 = vmatpush.xpose.msk.msra.mxu2 %vm638_vm1, %v1136_v10 }
 0x629   : > { %v1225_v11 = vpop.permute.xlu0 %1224 }
 0x62a   : > { %2129 = vmatpush.xpose.msk.msrb.mxu1 %vm638_vm1, %v1225_v11 }
 0x631   : > { %v1134_v16 = vpop.permute.xlu0 %1133 }
 0x634   : > { %1222 = vrot.lane.b32.xlu1 %v2539_v50, %s2896_s23  ;;  %s2913_s23 = smov 64  }
 0x68e   : > { %v1058_v12 = vpop.xlane.xlu1 %1057 }
 0x68f   : > { %2236 = vrcp.f32 %v1058_v12 }
 0x693   : > { %v1019_v13 = vpop.f32.mrf.mxu3 }
 0x694   : > { %2124 = vmatmul.msk.f32.vlgmr.msra.gmra.mxu1 %vm638_vm1, %v1019_v13 }
 0x695   : > { %v2237_v14 = vpop.eup %2236  ;;  %1394 = vmatpush.msra.mxu1 %v1393_v3 }
 0x696   : > { %v1060_v15 = vmul.f32 %v2237_v14, %v2235_v7 }
 0x697   : > { %1395 = vmatpush.msra.mxu1 %v1392_v4  ;;  %v2216_v4 = vld [vmem:[%s2879_s9 + $0x1] ss:$0 sm:$0xff] }
 0x698   : > { %2122 = vmatmul.msk.f32.vlgmr.msrb.gmra.mxu2 %vm638_vm1, %v1060_v15 }
 0x699   : > { %1396 = vmatpush.msra.mxu1 %v1391_v5 }
 0x69b   : > { %1397 = vmatpush.msra.mxu1 %v1390_v6 }
 0x69d   : > { %1398 = vmatpush.msra.mxu1 %v1389_v18 }
 0x6a0   : > { %2126 = vmatmul.msk.f32.vlgmr.msra.gmra.mxu2 %vm638_vm1, %v1134_v16 }
 0x6a6   : > { %v1223_v17 = vpop.permute.xlu1 %1222 }
 0x6a7   : > { %2130 = vmatmul.msk.f32.vlgmr.msrb.gmra.mxu1 %vm638_vm1, %v1223_v17 }
 0x711   : > { %v1130_v21 = vpop.f32.mrf.mxu1 }
 0x71b   : > { %v1084_v20 = vpop.f32.mrf.mxu2 }
 0x71c   : > { %2123 = vmatmul.msk.f32.vlgmr.msra.gmra.mxu3 %vm638_vm1, %v1084_v20  ;;  %v1388_v20 = vld [vmem:[%s2884_s14 + $0x50] sm:$0xff] }
 0x71d   : > { %1399 = vmatpush.msra.mxu1 %v1388_v20 }
 0x723   : > { %v1158_v22 = vpop.f32.mrf.mxu2 }
 0x724   : > { %v1247_v23 = vpop.f32.mrf.mxu1  ;;  %v1161_v24 = vsel %vm638_vm1, %v1158_v22, -inf }
 0x725   : > { %1162 = vmax.xlane.f32.xlu2 %v1161_v24  ;;  %v1250_v25 = vsel %vm638_vm1, %v1247_v23, -inf  ;;  %v1384_v24 = vld [vmem:[%s2884_s14 + $0x30] sm:$0xff] }
 0x726   : > { %1251 = vmax.xlane.f32.xlu0 %v1250_v25  ;;  %v1383_v25 = vld [vmem:[%s2884_s14 + $0x28] sm:$0xff] }
 0x73d   : > { %1261 = vrot.lane.b32.xlu2 %v2539_v50, %s2891_s21  ;;  %s2914_s21 = smov 40  }
 0x798   : > { %v1163_v26 = vpop.xlane.xlu2 %1162 }
 0x799   : > { %v1164_v28 = vsub.f32 %v1158_v22, %v1163_v26  ;;  %v1252_v29 = vpop.xlane.xlu0 %1251  ;;  %v1386_v22 = vld [vmem:[%s2884_s14 + $0x40] sm:$0xff] }
 0x79a   : > { %v1253_v30 = vsub.f32 %v1247_v23, %v1252_v29  ;;  %v1385_v23 = vld [vmem:[%s2884_s14 + $0x38] sm:$0xff]  ;;  %v1382_v26 = vld [vmem:[%s2884_s14 + $0x20] sm:$0xff]  ;;  %v1380_v29 = vld [vmem:[%s2884_s14 + $0x10] sm:$0xff] }
 0x79b   : > { %v1165_v31 = vmul.f32 1.442695, %v1164_v28  ;;  %v1381_v28 = vld [vmem:[%s2884_s14 + $0x18] sm:$0xff] }
 0x79c   : > { %v1254_v32 = vmul.f32 1.442695, %v1253_v30  ;;  %v1379_v30 = vld [vmem:[%s2884_s14 + $0x8] sm:$0xff] }
 0x79d   : > { %2238 = vpow2.f32 %v1165_v31  ;;  %v1378_v31 = vld [vmem:[%s2884_s14] sm:$0xff] }
 0x79e   : > { %2240 = vpow2.f32 %v1254_v32  ;;  %v2214_v32 = vld [vmem:[%s2883_s13] ss:$0 sm:$0xff] }
 0x79f   : > { %v1107_v48 = vpop.f32.mrf.mxu3 }
 0x7a0   : > { %v1262_v33 = vpop.permute.xlu2 %1261 }
 0x7a1   : > { %1282 = vmatpush.msrb.mxu2 %v1262_v33 }
 0x7a3   : > { %v2239_v34 = vpop.eup %2238 }
 0x7a4   : > { %v2241_v35 = vpop.eup %2240  ;;  %v1167_v36 = vsel %vm638_vm1, %v2239_v34, 0.0 }
 0x7a5   : > { %1168 = vadd.xlane.f32.xlu0 %v1167_v36  ;;  %v1256_v37 = vsel %vm638_vm1, %v2241_v35, 0.0 }
 0x7a6   : > { %1257 = vadd.xlane.f32.xlu1 %v1256_v37 }
 0x7b9   : > { %1172 = vrot.lane.b32.xlu0 %v2539_v50, %s2893_s24  ;;  %v1131_v50 = vadd.f32 %v1130_v21, %v1107_v48  ;;  %v1387_v21 = vld [vmem:[%s2884_s14 + $0x48] sm:$0xff] }
 0x7ba   : > { %1400 = vmatpush.msra.mxu1 %v1387_v21 }
 0x7bc   : > { %1401 = vmatpush.msra.mxu1 %v1386_v22 }
 0x7be   : > { %1402 = vmatpush.msra.mxu1 %v1385_v23 }
 0x7c0   : > { %1403 = vmatpush.msra.mxu1 %v1384_v24 }
 0x7c2   : > { %1404 = vmatpush.msra.mxu1 %v1383_v25 }
 0x7c4   : > { %1405 = vmatpush.msra.mxu1 %v1382_v26 }
 0x7c6   : > { %1406 = vmatpush.msra.mxu1 %v1381_v28 }
 0x7c8   : > { %1407 = vmatpush.msra.mxu1 %v1380_v29 }
 0x7ca   : > { %1408 = vmatpush.msra.mxu1 %v1379_v30 }
 0x7cc   : > { %1409 = vmatpush.msra.mxu1 %v1378_v31 }
 0x818   : > { %v1169_v39 = vpop.xlane.xlu0 %1168 }
 0x819   : > { %v1258_v38 = vpop.xlane.xlu1 %1257 }
 0x81a   : > { %2242 = vrcp.f32 %v1258_v38 }
 0x81b   : > { %2244 = vrcp.f32 %v1169_v39 }
 0x820   : > { %v2243_v40 = vpop.eup %2242 }
 0x821   : > { %v1260_v41 = vmul.f32 %v2243_v40, %v2241_v35  ;;  %v2245_v42 = vpop.eup %2244 }
 0x822   : > { %v1171_v43 = vmul.f32 %v2245_v42, %v2239_v34 }
 0x823   : > { %2131 = vmatmul.msk.f32.vlgmr.msrb.gmra.mxu2 %vm638_vm1, %v1260_v41 }
 0x82b   : > { %v1173_v44 = vpop.permute.xlu0 %1172 }
 0x82c   : > { %1193 = vmatpush.msrb.mxu3 %v1173_v44  ;;  %v2215_v44 = vld [vmem:[%s2885_s15] ss:$0 sm:$0xff] }
 0x82d   : > { %2127 = vmatmul.msk.f32.vlgmr.msrb.gmra.mxu3 %vm638_vm1, %v1171_v43 }
 0x82e   : > { %1305 = vmatpush.msra.mxu3 %v901_v45 }
 0x8a6   : > { %v1284_v47 = vpop.f32.mrf.mxu2 }
 0x8a7   : > { %2132 = vmatmul.msk.f32.vlgmr.msra.gmra.mxu3 %vm638_vm1, %v1284_v47 }
 0x8b0   : > { %v1195_v49 = vpop.f32.mrf.mxu3 }
 0x8b1   : > { %2128 = vmatmul.msk.f32.vlgmr.msra.gmra.mxu0 %vm638_vm1, %v1195_v49 }
 0x92a   : > { %v1307_v53 = vpop.f32.mrf.mxu3 }
 0x92e   : > { %v1218_v51 = vpop.f32.mrf.mxu0 }
 0x92f   : > { %v1221_v52 = vadd.f32 %v1218_v51, %v1131_v50 }
 0x931   : > { %v1310_v54 = vadd.f32 %v1307_v53, %v1221_v52 }
 0x933   : > { %v1311_v56 = vadd.f32 %v1310_v54, %v2513_v19  ;;  %v1340_v19 = vld [vmem:[%s2882_s12 + $0x10] sm:$0xff]  ;;  %v2137_v54 = vld [vmem:[%s2878_s8 + $0x38] sm:$0xff] }
 0x934   : > { %1362 = vmatpush.msrb.mxu0 %v1340_v19  ;;  %1474 = vmatpush.msra.mxu2 %v2137_v54  ;;  %v2140_v54 = vld [vmem:[%s2880_s10 + $0x28] sm:$0xff] }
 0x935   : > { %v2604_v57 = vadd.f32 %v2213_v55, %v1311_v56  ;;  %v2136_v55 = vld [vmem:[%s2878_s8 + $0x30] sm:$0xff]  ;;  %v2135_v56 = vld [vmem:[%s2878_s8 + $0x28] sm:$0xff] }
 0x936   : > { %1363 = vmatpush.msrb.mxu0 %v1339_v1  ;;  %1475 = vmatpush.msra.mxu2 %v2136_v55 }
 0x937   : > { %v1316_v58 = vsel %vm801_vm2, %v2604_v57, 0.0 }
 0x938   : > { %1317 = vadd.xlane.f32.xlu1 %v1316_v58  ;;  %1364 = vmatpush.msrb.mxu0 %v1338_v2 }
 0x939   : > { %1476 = vmatpush.msra.mxu2 %v2135_v56  ;;  %v2139_v56 = vld [vmem:[%s2880_s10 + $0x20] sm:$0xff] }
 0x9ab   : > { %v1318_v59 = vpop.xlane.xlu1 %1317 }
 0x9ac   : > { %v1319_v60 = vmul.f32 %v1318_v59, %v2517_v27 }
 0x9ae   : > { %v1320_v61 = vsub.f32 %v2604_v57, %v1319_v60 }
 0x9b0   : > { %v1321_v62 = vmul.f32 %v1320_v61, %v1320_v61 }
 0x9b2   : > { %v1322_v63 = vsel %vm801_vm2, %v1321_v62, 0.0 }
 0x9b3   : > { %1323 = vadd.xlane.f32.xlu0 %v1322_v63 }
 0xa26   : > { %v1324_v7 = vpop.xlane.xlu0 %1323 }
 0xa27   : > { %v1325_v8 = vmul.f32 %v1324_v7, %v2517_v27 }
 0xa29   : > { %v1326_v9 = vadd.f32 1e-05, %v1325_v8 }
 0xa2b   : > { %2246 = vrsqrt.f32 %v1326_v9  ;;  %vm1333_vm8 = vweird.f32 %v1326_v9 }
 0xa31   : > { %v2247_v10 = vpop.eup %2246 }
 0xa32   : > { %v1328_v11 = vmul.f32 %v2247_v10, %v1326_v9  ;;  %vm1334_vm7 = vweird.f32 %v2247_v10 }
 0xa33   : > { %vm1335_vm9 = vmor %vm1333_vm8, %vm1334_vm7  ;;  %vm2032_vm7 = vcmask 0  }
 0xa34   : > { %v1329_v12 = vmul.f32 %v2247_v10, %v1328_v11 }
 0xa36   : > { %v1330_v13 = vmul.f32 0.5, %v1329_v12 }
 0xa38   : > { %v1331_v14 = vsub.f32 1.5, %v1330_v13 }
 0xa3a   : > { %v1332_v15 = vmul.f32 %v2247_v10, %v1331_v14 }
 0xa3c   : > { %v1336_v16 = vsel %vm1335_vm9, %v2247_v10, %v1332_v15 }
 0xa3d   : > { %v1337_v17 = vmul.f32 %v1336_v16, %v1320_v61 }
 0xa3f   : > { %2133 = vmatmul.msk.f32.vlgmr.msrb.gmra.mxu0 %vm801_vm2, %v1337_v17 }
 0xabc   : > { %v1366_v33 = vpop.f32.mrf.mxu0 }
 0xabd   : > { %v1367_v34 = vadd.f32 %v2214_v32, %v1366_v33 }
 0xabf   : > { %v1370_v35 = vmul.f32 %v1367_v34, %v1367_v34  ;;  %v1369_v41 = vmul.f32 0.5, %v1367_v34 }
 0xac1   : > { %v1371_v36 = vmul.f32 %v1370_v35, %v1367_v34 }
 0xac3   : > { %v1372_v37 = vmul.f32 0.044715, %v1371_v36 }
 0xac5   : > { %v1373_v38 = vadd.f32 %v1372_v37, %v1367_v34 }
 0xac7   : > { %v1374_v39 = vmul.f32 0.7978846, %v1373_v38 }
 0xac9   : > { %2248 = vtanh.f32 %v1374_v39 }
 0xacf   : > { %v2249_v40 = vpop.eup %2248 }
 0xad0   : > { %v1376_v42 = vadd.f32 1.0, %v2249_v40 }
 0xad2   : > { %v1377_v43 = vmul.f32 %v1376_v42, %v1369_v41 }
 0xad4   : > { %1410 = vmatmul.f32.vlgmr.msra.gmra.mxu1 %v1377_v43 }
 0xb51   : > { %v1411_v45 = vpop.f32.mrf.mxu1 }
 0xb52   : > { %v1414_v46 = vadd.f32 %v1411_v45, %v2604_v57  ;;  %v2134_v57 = vld [vmem:[%s2878_s8 + $0x20] sm:$0xff] }
 0xb53   : > { %1477 = vmatpush.msra.mxu2 %v2134_v57 }
 0xb54   : > { %v2680_v47 = vadd.f32 %v2215_v44, %v1414_v46 }
 0xb56   : > { %v1434_v48 = vsel %vm801_vm2, %v2680_v47, 0.0 }
 0xb57   : > { %1435 = vadd.xlane.f32.xlu2 %v1434_v48 }
 0xbca   : > { %v1436_v49 = vpop.xlane.xlu2 %1435 }
 0xbcb   : > { %v1437_v50 = vmul.f32 %v1436_v49, %v2517_v27 }
 0xbcd   : > { %v1438_v51 = vsub.f32 %v2680_v47, %v1437_v50 }
 0xbcf   : > { %v1439_v52 = vmul.f32 %v1438_v51, %v1438_v51 }
 0xbd1   : > { %v1440_v53 = vsel %vm801_vm2, %v1439_v52, 0.0 }
 0xbd2   : > { %1441 = vadd.xlane.f32.xlu1 %v1440_v53 }
 0xc45   : > { %v1442_v58 = vpop.xlane.xlu1 %1441 }
 0xc46   : > { %v1443_v59 = vmul.f32 %v1442_v58, %v2517_v27 }
 0xc48   : > { %v1444_v60 = vadd.f32 1e-05, %v1443_v59 }
 0xc4a   : > { %2250 = vrsqrt.f32 %v1444_v60  ;;  %vm1451_vm11 = vweird.f32 %v1444_v60 }
 0xc50   : > { %v2251_v61 = vpop.eup %2250 }
 0xc51   : > { %v1446_v62 = vmul.f32 %v2251_v61, %v1444_v60  ;;  %vm1452_vm10 = vweird.f32 %v2251_v61 }
 0xc52   : > { %vm1453_vm12 = vmor %vm1451_vm11, %vm1452_vm10 }
 0xc53   : > { %v1447_v63 = vmul.f32 %v2251_v61, %v1446_v62 }
 0xc55   : > { %v1448_v0 = vmul.f32 0.5, %v1447_v63 }
 0xc57   : > { %v1449_v19 = vsub.f32 1.5, %v1448_v0 }
 0xc59   : > { %v1450_v1 = vmul.f32 %v2251_v61, %v1449_v19  ;;  %v2141_v19 = vld [vmem:[%s2880_s10 + $0x30] sm:$0xff] }
 0xc5b   : > { %v1454_v2 = vsel %vm1453_vm12, %v2251_v61, %v1450_v1  ;;  %v2142_v1 = vld [vmem:[%s2880_s10 + $0x38] sm:$0xff] }
 0xc5c   : > { %v1455_v3 = vmul.f32 %v1454_v2, %v1438_v51  ;;  %1829 = vmatpush.msrb.mxu1 %v2142_v1 }
 0xc5e   : > { %2144 = vmatmul.msk.f32.vlgmr.msra.gmra.mxu2 %vm801_vm2, %v1455_v3 }
 0xce1   : > { %v1479_v5 = vpop.f32.mrf.mxu2 }
 0xce2   : > { %v2704_v6 = vadd.f32 %v2216_v4, %v1479_v5 }
 0xce4   : > { %1483 = vrot.lane.b32.xlu0 %v2704_v6, %s2290_s26  ;;  %1548 = vrot.lane.b32.xlu1 %v2704_v6, %s2291_s27  ;;  %s2910_s26 = smov 56   ;;  %s2911_s27 = smov 72  }
 0xcec   : > { %1659 = vrot.lane.b32.xlu0 %v2704_v6, %s2906_s0  ;;  %1546 = vrot.lane.b32.xlu1 %v2704_v6, %s2907_s19  ;;  %s570_s19 = scalar_lea.vmem %s2888_s18, %s2916_s30 }
 0xcf4   : > { %1657 = vrot.lane.b32.xlu0 %v2704_v6, %s2908_s25 }
 0xcfc   : > { %1746 = vrot.lane.b32.xlu0 %v2704_v6, %s2909_s17 }
 0xd56   : > { %v1484_v7 = vpop.permute.xlu0 %1483  ;;  %v1549_v8 = vpop.permute.xlu1 %1548 }
 0xd57   : > { %2145 = vmatpush.xpose.msk.msrb.mxu3 %vm638_vm1, %v1484_v7  ;;  %2148 = vmatpush.xpose.msk.msrb.mxu2 %vm638_vm1, %v1549_v8 }
 0xd5a   : > { %2146 = vmatmul.msk.f32.vlgmr.msrb.gmra.mxu3 %vm638_vm1, %v2704_v6 }
 0xd5b   : > { %1652 = vmatpush.msra.mxu2 %v2139_v56 }
 0xd5e   : > { %v1547_v9 = vpop.permute.xlu1 %1546  ;;  %v1660_v18 = vpop.permute.xlu0 %1659 }
 0xd5f   : > { %2149 = vmatmul.msk.f32.vlgmr.msrb.gmra.mxu2 %vm638_vm1, %v1547_v9 }
 0xd60   : > { %1740 = vmatpush.msrb.mxu2 %v2141_v19  ;;  %v2219_v19 = vld [vmem:[%s2885_s15 + $0x1] ss:$0 sm:$0xff] }
 0xd66   : > { %v1658_v32 = vpop.permute.xlu0 %1657 }
 0xd6e   : > { %v1747_v33 = vpop.permute.xlu0 %1746 }
 0xddd   : > { %v1506_v12 = vpop.f32.mrf.mxu3 }
 0xdde   : > { %v1509_v13 = vsel %vm638_vm1, %v1506_v12, -inf }
 0xde2   : > { %v1571_v10 = vpop.f32.mrf.mxu2 }
 0xde3   : > { %v1574_v11 = vsel %vm638_vm1, %v1571_v10, -inf }
 0xde4   : > { %1575 = vmax.xlane.f32.xlu2 %v1574_v11  ;;  %v2217_v11 = vld [vmem:[%s2881_s11 + $0x1] ss:$0 sm:$0xff] }
 0xdfc   : > { %1585 = vrot.lane.b32.xlu2 %v2704_v6, %s2910_s26 }
 0xe04   : > { %1748 = vrot.lane.b32.xlu2 %v2704_v6, %s2911_s27 }
 0xe2d   : > { %1510 = vmax.xlane.f32.xlu2 %v1509_v13 }
 0xe57   : > { %v1576_v14 = vpop.xlane.xlu2 %1575 }
 0xe58   : > { %v1577_v15 = vsub.f32 %v1571_v10, %v1576_v14 }
 0xe5a   : > { %v1578_v16 = vmul.f32 1.442695, %v1577_v15 }
 0xe5c   : > { %2252 = vpow2.f32 %v1578_v16 }
 0xe5f   : > { %v1586_v17 = vpop.permute.xlu2 %1585 }
 0xe60   : > { %1606 = vmatpush.msra.mxu3 %v1586_v17 }
 0xe62   : > { %2153 = vmatpush.xpose.msk.msrb.mxu3 %vm638_vm1, %v1660_v18  ;;  %v2253_v20 = vpop.eup %2252 }
 0xe63   : > { %v1580_v21 = vsel %vm638_vm1, %v2253_v20, 0.0 }
 0xe64   : > { %1581 = vadd.xlane.f32.xlu1 %v1580_v21  ;;  %v2164_v21 = vld [vmem:[%s2882_s12 + $0x38] sm:$0xff] }
 0xe67   : > { %v1749_v22 = vpop.permute.xlu2 %1748 }
 0xea0   : > { %v1511_v23 = vpop.xlane.xlu2 %1510 }
 0xea1   : > { %v1512_v24 = vsub.f32 %v1506_v12, %v1511_v23  ;;  %v2161_v23 = vld [vmem:[%s2882_s12 + $0x20] sm:$0xff] }
 0xea3   : > { %v1513_v25 = vmul.f32 1.442695, %v1512_v24  ;;  %v2182_v24 = vld [vmem:[%s2884_s14 + $0xf8] sm:$0xff] }
 0xea5   : > { %2254 = vpow2.f32 %v1513_v25  ;;  %v2181_v25 = vld [vmem:[%s2884_s14 + $0xf0] sm:$0xff] }
 0xeab   : > { %v2255_v26 = vpop.eup %2254 }
 0xeac   : > { %v1515_v28 = vsel %vm638_vm1, %v2255_v26, 0.0 }
 0xead   : > { %1516 = vadd.xlane.f32.xlu1 %v1515_v28  ;;  %v2179_v28 = vld [vmem:[%s2884_s14 + $0xe0] sm:$0xff] }
 0xed7   : > { %v1582_v29 = vpop.xlane.xlu1 %1581 }
 0xed8   : > { %2256 = vrcp.f32 %v1582_v29 }
 0xede   : > { %v2257_v30 = vpop.eup %2256 }
 0xedf   : > { %v1584_v31 = vmul.f32 %v2257_v30, %v2253_v20 }
 0xee1   : > { %2150 = vmatmul.msk.f32.vlgmr.msra.gmra.mxu3 %vm638_vm1, %v1584_v31 }
 0xee2   : > { %2157 = vmatpush.xpose.msk.msra.mxu3 %vm638_vm1, %v1749_v22  ;;  %v2162_v22 = vld [vmem:[%s2882_s12 + $0x28] sm:$0xff] }
 0xee9   : > { %2154 = vmatmul.msk.f32.vlgmr.msrb.gmra.mxu3 %vm638_vm1, %v1658_v32 }
 0xeea   : > { %1921 = vmatpush.msrb.mxu3 %v2182_v24 }
 0xeec   : > { %1922 = vmatpush.msrb.mxu3 %v2181_v25 }
 0xef1   : > { %2158 = vmatmul.msk.f32.vlgmr.msra.gmra.mxu3 %vm638_vm1, %v1747_v33 }
 0xf20   : > { %v1517_v39 = vpop.xlane.xlu1 %1516 }
 0xf64   : > { %v1608_v34 = vpop.f32.mrf.mxu3 }
 0xf6c   : > { %v1682_v35 = vpop.f32.mrf.mxu3 }
 0xf6d   : > { %v1685_v36 = vsel %vm638_vm1, %v1682_v35, -inf }
 0xf6e   : > { %1686 = vmax.xlane.f32.xlu0 %v1685_v36 }
 0xf74   : > { %v1771_v37 = vpop.f32.mrf.mxu3 }
 0xf75   : > { %v1774_v38 = vsel %vm638_vm1, %v1771_v37, -inf }
 0xf76   : > { %1775 = vmax.xlane.f32.xlu1 %v1774_v38 }
 0xf82   : > { %1696 = vrot.lane.b32.xlu0 %v2704_v6, %s2912_s1 }
 0xf8f   : > { %1520 = vrot.lane.b32.xlu1 %v2704_v6, %s2913_s23 }
 0xfe1   : > { %v1687_v40 = vpop.xlane.xlu0 %1686 }
 0xfe2   : > { %v1688_v41 = vsub.f32 %v1682_v35, %v1687_v40  ;;  %v2178_v40 = vld [vmem:[%s2884_s14 + $0xd8] sm:$0xff] }
 0xfe4   : > { %v1689_v42 = vmul.f32 1.442695, %v1688_v41  ;;  %v2177_v41 = vld [vmem:[%s2884_s14 + $0xd0] sm:$0xff] }
 0xfe6   : > { %2258 = vpow2.f32 %v1689_v42  ;;  %v2176_v42 = vld [vmem:[%s2884_s14 + $0xc8] sm:$0xff] }
 0xfe9   : > { %v1776_v43 = vpop.xlane.xlu1 %1775 }
 0xfea   : > { %v1777_v44 = vsub.f32 %v1771_v37, %v1776_v43  ;;  %v2175_v43 = vld [vmem:[%s2884_s14 + $0xc0] sm:$0xff] }
 0xfec   : > { %v2259_v45 = vpop.eup %2258  ;;  %v1778_v46 = vmul.f32 1.442695, %v1777_v44  ;;  %v2174_v44 = vld [vmem:[%s2884_s14 + $0xb8] sm:$0xff] }
 0xfed   : > { %v1691_v48 = vsel %vm638_vm1, %v2259_v45, 0.0 }
 0xfee   : > { %2260 = vpow2.f32 %v1778_v46  ;;  %1692 = vadd.xlane.f32.xlu2 %v1691_v48  ;;  %v2172_v46 = vld [vmem:[%s2884_s14 + $0xa8] sm:$0xff]  ;;  %v2171_v48 = vld [vmem:[%s2884_s14 + $0xa0] sm:$0xff] }
 0xfef   : > { %2262 = vrcp.f32 %v1517_v39 }
 0xff4   : > { %v2261_v49 = vpop.eup %2260  ;;  %v1697_v55 = vpop.permute.xlu0 %1696 }
 0xff5   : > { %v1780_v50 = vsel %vm638_vm1, %v2261_v49, 0.0  ;;  %v2263_v51 = vpop.eup %2262 }
 0xff6   : > { %1781 = vadd.xlane.f32.xlu1 %v1780_v50  ;;  %v1519_v52 = vmul.f32 %v2263_v51, %v2255_v26  ;;  %v2180_v26 = vld [vmem:[%s2884_s14 + $0xe8] sm:$0xff]  ;;  %v2169_v50 = vld [vmem:[%s2884_s14 + $0x90] sm:$0xff] }
 0xff7   : > { %1923 = vmatpush.msrb.mxu3 %v2180_v26  ;;  %v2168_v51 = vld [vmem:[%s2884_s14 + $0x88] sm:$0xff] }
 0xff9   : > { %1924 = vmatpush.msrb.mxu3 %v2179_v28 }
 0xffb   : > { %1925 = vmatpush.msrb.mxu3 %v2178_v40  ;;  %v1989_v40 = vld [vmem:[#allocation2] sm:$0x1] }
 0xffd   : > { %1926 = vmatpush.msrb.mxu3 %v2177_v41 }
 0xfff   : > { %1927 = vmatpush.msrb.mxu3 %v2176_v42 }
0x1001   : > { %v1521_v53 = vpop.permute.xlu1 %1520  ;;  %1928 = vmatpush.msrb.mxu3 %v2175_v43 }
0x1002   : > { %1541 = vmatpush.msra.mxu0 %v1521_v53  ;;  %v2218_v53 = vld [vmem:[%s2883_s13 + $0x1] ss:$0 sm:$0xff] }
0x1003   : > { %2147 = vmatmul.msk.f32.vlgmr.msra.gmra.mxu0 %vm638_vm1, %v1519_v52  ;;  %1929 = vmatpush.msrb.mxu3 %v2174_v44  ;;  %v2167_v52 = vld [vmem:[%s2884_s14 + $0x80] sm:$0xff] }
0x1004   : > { %1629 = vmatpush.msrb.mxu0 %v2140_v54 }
0x1006   : > { %1717 = vmatpush.msra.mxu0 %v1697_v55  ;;  %1785 = vrot.lane.b32.xlu2 %v2704_v6, %s2914_s21 }
0x100b   : > { %2151 = vmatmul.msk.f32.vlgmr.msrb.gmra.mxu0 %vm638_vm1, %v1608_v34 }
0x1061   : > { %v1693_v57 = vpop.xlane.xlu2 %1692 }
0x1062   : > { %2264 = vrcp.f32 %v1693_v57 }
0x1068   : > { %v2265_v58 = vpop.eup %2264 }
0x1069   : > { %v1695_v59 = vmul.f32 %v2265_v58, %v2259_v45  ;;  %v1782_v60 = vpop.xlane.xlu1 %1781  ;;  %v1786_v61 = vpop.permute.xlu2 %1785  ;;  %v2173_v45 = vld [vmem:[%s2884_s14 + $0xb0] sm:$0xff] }
0x106a   : > { %2266 = vrcp.f32 %v1782_v60  ;;  %1806 = vmatpush.msrb.mxu0 %v1786_v61  ;;  %1930 = vmatpush.msrb.mxu3 %v2173_v45 }
0x106b   : > { %2155 = vmatmul.msk.f32.vlgmr.msra.gmra.mxu0 %vm638_vm1, %v1695_v59 }
0x106c   : > { %1931 = vmatpush.msrb.mxu3 %v2172_v46 }
0x106e   : > { %1932 = vmatpush.msrb.mxu3 %v2171_v48 }
0x1070   : > { %v2267_v62 = vpop.eup %2266 }
0x1071   : > { %v1784_v63 = vmul.f32 %v2267_v62, %v2261_v49  ;;  %v2170_v49 = vld [vmem:[%s2884_s14 + $0x98] sm:$0xff] }
0x1072   : > { %1933 = vmatpush.msrb.mxu3 %v2170_v49 }
0x1073   : > { %2159 = vmatmul.msk.f32.vlgmr.msrb.gmra.mxu0 %vm638_vm1, %v1784_v63 }
0x1074   : > { %1934 = vmatpush.msrb.mxu3 %v2169_v50 }
0x1076   : > { %1935 = vmatpush.msrb.mxu3 %v2168_v51 }
0x1078   : > { %1936 = vmatpush.msrb.mxu3 %v2167_v52 }
0x1080   : > { %v1543_v0 = vpop.f32.mrf.mxu0 }
0x1081   : > { %2152 = vmatmul.msk.f32.vlgmr.msra.gmra.mxu2 %vm638_vm1, %v1543_v0 }
0x1082   : > { %1887 = vmatpush.msra.mxu2 %v2164_v21 }
0x1088   : > { %v1631_v2 = vpop.f32.mrf.mxu0 }
0x10e8   : > { %v1719_v3 = vpop.f32.mrf.mxu0 }
0x10e9   : > { %2156 = vmatmul.msk.f32.vlgmr.msrb.gmra.mxu2 %vm638_vm1, %v1719_v3 }
0x10f0   : > { %v1808_v4 = vpop.f32.mrf.mxu0 }
0x10f1   : > { %2160 = vmatmul.msk.f32.vlgmr.msrb.gmra.mxu1 %vm638_vm1, %v1808_v4 }
0x1104   : > { %v1654_v5 = vpop.f32.mrf.mxu2 }
0x1105   : > { %v1655_v6 = vadd.f32 %v1654_v5, %v1631_v2 }
0x116c   : > { %v1742_v7 = vpop.f32.mrf.mxu2 }
0x116d   : > { %v1745_v8 = vadd.f32 %v1742_v7, %v1655_v6 }
0x116e   : > { %v1831_v9 = vpop.f32.mrf.mxu1 }
0x116f   : > { %v1834_v10 = vadd.f32 %v1831_v9, %v1745_v8 }
0x1171   : > { %v1835_v12 = vadd.f32 %v1834_v10, %v2680_v47  ;;  %v2163_v47 = vld [vmem:[%s2882_s12 + $0x30] sm:$0xff] }
0x1172   : > { %1888 = vmatpush.msra.mxu2 %v2163_v47 }
0x1173   : > { %v2769_v13 = vadd.f32 %v2217_v11, %v1835_v12  ;;  %v1988_v11 = vld [vmem:[%s2886_s16 + $0x18] sm:$0xff]  ;;  %v1987_v12 = vld [vmem:[%s2886_s16 + $0x10] sm:$0xff] }
0x1174   : > { %1889 = vmatpush.msra.mxu2 %v2162_v22  ;;  %2005 = vmatpush.msra.mxu0 %v1988_v11 }
0x1175   : > { %v1840_v14 = vsel %vm801_vm2, %v2769_v13, 0.0 }
0x1176   : > { %1841 = vadd.xlane.f32.xlu0 %v1840_v14  ;;  %1890 = vmatpush.msra.mxu2 %v2161_v23  ;;  %v1986_v14 = vld [vmem:[%s2886_s16 + $0x8] sm:$0xff] }
0x1177   : > { %2006 = vmatpush.msra.mxu0 %v1987_v12 }
0x1179   : > { %2007 = vmatpush.msra.mxu0 %v1986_v14 }
0x11e9   : > { %v1842_v15 = vpop.xlane.xlu0 %1841 }
0x11ea   : > { %v1843_v16 = vmul.f32 %v1842_v15, %v2517_v27 }
0x11ec   : > { %v1844_v17 = vsub.f32 %v2769_v13, %v1843_v16  ;;  %v1985_v16 = vld [vmem:[%s2886_s16] sm:$0xff] }
0x11ed   : > { %2008 = vmatpush.msra.mxu0 %v1985_v16 }
0x11ee   : > { %v1845_v18 = vmul.f32 %v1844_v17, %v1844_v17 }
0x11f0   : > { %v1846_v20 = vsel %vm801_vm2, %v1845_v18, 0.0 }
0x11f1   : > { %1847 = vadd.xlane.f32.xlu2 %v1846_v20 }
0x1264   : > { %v1848_v29 = vpop.xlane.xlu2 %1847 }
0x1265   : > { %v1849_v30 = vmul.f32 %v1848_v29, %v2517_v27 }
0x1267   : > { %v1850_v31 = vadd.f32 1e-05, %v1849_v30 }
0x1269   : > { %2268 = vrsqrt.f32 %v1850_v31  ;;  %vm1857_vm14 = vweird.f32 %v1850_v31 }
0x126f   : > { %v2269_v32 = vpop.eup %2268 }
0x1270   : > { %v1852_v33 = vmul.f32 %v2269_v32, %v1850_v31  ;;  %vm1858_vm13 = vweird.f32 %v2269_v32 }
0x1271   : > { %vm1859_vm15 = vmor %vm1857_vm14, %vm1858_vm13 }
0x1272   : > { %v1853_v34 = vmul.f32 %v2269_v32, %v1852_v33 }
0x1274   : > { %v1854_v35 = vmul.f32 0.5, %v1853_v34 }
0x1276   : > { %v1855_v36 = vsub.f32 1.5, %v1854_v35 }
0x1278   : > { %v1856_v37 = vmul.f32 %v2269_v32, %v1855_v36 }
0x127a   : > { %v1860_v38 = vsel %vm1859_vm15, %v2269_v32, %v1856_v37 }
0x127b   : > { %v1861_v39 = vmul.f32 %v1860_v38, %v1844_v17  ;;  %v2300_v17 = vmov 8.0  }
0x127d   : > { %2166 = vmatmul.msk.f32.vlgmr.msra.gmra.mxu2 %vm801_vm2, %v1861_v39 }
0x1300   : > { %v1892_v54 = vpop.f32.mrf.mxu2 }
0x1301   : > { %v1893_v55 = vadd.f32 %v2218_v53, %v1892_v54 }
0x1303   : > { %v1896_v56 = vmul.f32 %v1893_v55, %v1893_v55  ;;  %v1895_v62 = vmul.f32 0.5, %v1893_v55 }
0x1305   : > { %v1897_v57 = vmul.f32 %v1896_v56, %v1893_v55 }
0x1307   : > { %v1898_v58 = vmul.f32 0.044715, %v1897_v57 }
0x1309   : > { %v1899_v59 = vadd.f32 %v1898_v58, %v1893_v55 }
0x130b   : > { %v1900_v60 = vmul.f32 0.7978846, %v1899_v59 }
0x130d   : > { %2270 = vtanh.f32 %v1900_v60 }
0x1313   : > { %v2271_v61 = vpop.eup %2270 }
0x1314   : > { %v1902_v63 = vadd.f32 1.0, %v2271_v61 }
0x1316   : > { %v1903_v0 = vmul.f32 %v1902_v63, %v1895_v62 }
0x1318   : > { %1937 = vmatmul.f32.vlgmr.msrb.gmra.mxu3 %v1903_v0 }
0x139b   : > { %v1938_v1 = vpop.f32.mrf.mxu3 }
0x139c   : > { %v1941_v2 = vadd.f32 %v1938_v1, %v2769_v13 }
0x139e   : > { %v1947_v3 = vadd.f32 %v2219_v19, %v1941_v2 }
0x13a0   : > { %v1948_v4 = vsel %vm801_vm2, %v1947_v3, 0.0 }
0x13a1   : > { %1949 = vadd.xlane.f32.xlu1 %v1948_v4 }
0x1414   : > { %v1950_v5 = vpop.xlane.xlu1 %1949 }
0x1415   : > { %v1951_v6 = vmul.f32 %v1950_v5, %v2517_v27 }
0x1417   : > { %v1952_v7 = vsub.f32 %v1947_v3, %v1951_v6 }
0x1419   : > { %v1953_v8 = vmul.f32 %v1952_v7, %v1952_v7 }
0x141b   : > { %v1954_v9 = vsel %vm801_vm2, %v1953_v8, 0.0 }
0x141c   : > { %1955 = vadd.xlane.f32.xlu1 %v1954_v9 }
0x148f   : > { %v1956_v10 = vpop.xlane.xlu1 %1955 }
0x1490   : > { %v1957_v13 = vmul.f32 %v1956_v10, %v2517_v27 }
0x1492   : > { %v1958_v15 = vadd.f32 1e-05, %v1957_v13 }
0x1494   : > { %2272 = vrsqrt.f32 %v1958_v15  ;;  %vm1965_vm1 = vweird.f32 %v1958_v15 }
0x1495   : > { %2274 = vrcp.f32 %v2300_v17 }
0x149a   : > { %v2273_v18 = vpop.eup %2272 }
0x149b   : > { %v1960_v20 = vmul.f32 %v2273_v18, %v1958_v15  ;;  %v2275_v27 = vpop.eup %2274  ;;  %vm1966_vm0 = vweird.f32 %v2273_v18 }
0x149c   : > { %v1978_v23 = vmul.f32 8.0, %v2275_v27  ;;  %vm1967_vm3 = vmor %vm1965_vm1, %vm1966_vm0  ;;  %vm1982_vm4 = vweird.f32 %v2275_v27 }
0x149d   : > { %v1961_v21 = vmul.f32 %v2273_v18, %v1960_v20 }
0x149e   : > { %v1979_v28 = vsub.f32 1.0, %v1978_v23 }
0x149f   : > { %v1962_v47 = vmul.f32 0.5, %v1961_v21 }
0x14a0   : > { %v1980_v31 = vmul.f32 %v2275_v27, %v1979_v28 }
0x14a1   : > { %v1963_v22 = vsub.f32 1.5, %v1962_v47 }
0x14a2   : > { %v1981_v34 = vadd.f32 %v2275_v27, %v1980_v31 }
0x14a3   : > { %v1964_v24 = vmul.f32 %v2273_v18, %v1963_v22 }
0x14a4   : > { %v1983_v37 = vsel %vm1982_vm4, %v2275_v27, %v1981_v34 }
0x14a5   : > { %v1968_v25 = vsel %vm1967_vm3, %v2273_v18, %v1964_v24 }
0x14a6   : > { %v1969_v26 = vmul.f32 %v1968_v25, %v1952_v7 }
0x14a8   : > { %v1970_v29 = vsel %vm801_vm2, %v1969_v26, 0.0 }
0x14a9   : > { %v1971_v30 = vrot.slane %v1970_v29, 4 }
0x14ab   : > { %v1972_v32 = vadd.f32 %v1971_v30, %v1970_v29 }
0x14ad   : > { %v1973_v33 = vrot.slane %v1972_v32, 2 }
0x14af   : > { %v1974_v35 = vadd.f32 %v1973_v33, %v1972_v32 }
0x14b1   : > { %v1975_v36 = vrot.slane %v1974_v35, 1 }
0x14b3   : > { %v1976_v38 = vadd.f32 %v1975_v36, %v1974_v35 }
0x14b5   : > { %v1984_v39 = vmul.f32 %v1983_v37, %v1976_v38 }
0x14b7   : > { %2184 = vmatmul.msk.f32.vlgmr.msra.gmra.mxu0 %vm801_vm2, %v1984_v39 }
0x1534   : > { %v2010_v41 = vpop.f32.mrf.mxu0 }
0x1535   : > { %v2011_v42 = vadd.f32 %v2010_v41, %v1989_v40 }
0x1537   : > { %v2185_v43 = vmul.f32 -1.442695, %v2011_v42 }
0x1539   : > { %2276 = vpow2.f32 %v2185_v43 }
0x153f   : > { %v2277_v44 = vpop.eup %2276 }
0x1540   : > { %v2016_v45 = vadd.f32 1.0, %v2277_v44 }
0x1542   : > { %2278 = vrcp.f32 %v2016_v45  ;;  %v2028_v50 = vand.u32 2147483648, %v2016_v45  ;;  %v2026_v52 = vand.u32 2147483647, %v2016_v45  ;;  %vm2022_vm6 = vweird.f32 %v2016_v45 }
0x1544   : > { %v2029_v54 = vor.u32 1.1754944e-38, %v2028_v50  ;;  %vm2027_vm8 = vcmp.eq.f32.partialorder %v2026_v52, 8.507059e+37 }
0x1548   : > { %v2279_v46 = vpop.eup %2278 }
0x1549   : > { %v2018_v48 = vmul.f32 %v2279_v46, %v2016_v45  ;;  %vm2023_vm5 = vweird.f32 %v2279_v46 }
0x154a   : > { %vm2024_vm2 = vmor %vm2022_vm6, %vm2023_vm5 }
0x154b   : > { %v2019_v49 = vsub.f32 1.0, %v2018_v48 }
0x154d   : > { %v2020_v51 = vmul.f32 %v2279_v46, %v2019_v49 }
0x154f   : > { %v2021_v53 = vadd.f32 %v2279_v46, %v2020_v51 }
0x1551   : > { %v2025_v55 = vsel %vm2024_vm2, %v2279_v46, %v2021_v53 }
0x1552   : > { %v2030_v56 = vsel %vm2027_vm8, %v2029_v54, %v2025_v55 }
0x1553   : > { %2033 = vst.msk [vmem:[%s570_s19] sm:$0x1] %vm2032_vm7, %v2030_v56 }
0x1554 PF: > { %s30_s29 = sadd.s32 1, %s2286_s29  }
0x1555   : > { %p27_p4 = scmp.ge.s32.totalorder %s30_s29, 4  }
0x1557   :  { %29 = sbr.rel (!%p27_p4) target bundleno = 4 (0x4), region = 134 }

</bundles_post_ra>
